<compile_context>
chip_gen: v7x
topology: tpu7x:2x2x1
jax: 0.10.0
libtpu: 0.0.40
codegen_flags: <defaults>
</compile_context>

<pallas_src>
import math
from functools import partial

import numpy as np
import jax
import jax.numpy as jnp
from jax import lax
from jax.experimental import pallas as pl
from jax.experimental.pallas import tpu as pltpu


# ---------------------------------------------------------------------------
# Pallas kernel: one grid step == one time chunk of Tc steps.
# ---------------------------------------------------------------------------
def lmu_seq_kernel(x_ref, h0_ref, m0_ref, encx_ref, ench_ref, encm_ref,
                   wx_ref, wh_ref, wm_ref, adt_ref, bt_ref,
                   hseq_ref, hfin_ref, mfin_ref, h_sc, m_sc, *, t_total):
    c = pl.program_id(0)
    tc_blk, bp, ip = x_ref.shape
    hp = wh_ref.shape[1]
    mat_dtype = wh_ref.dtype

    # Initialize the persistent VMEM state scratch from h0/m0 on chunk 0.
    @pl.when(c == 0)
    def _():
        h_sc[...] = h0_ref[...]
        m_sc[...] = m0_ref[...]

    # ---- chunk prologue: hoist the x projection off the serial chain ------
    # One (Tc*Bp, Ip) @ (Ip, Hp) MXU GEMM for the whole chunk; the result is
    # parked in the h_seq output block and consumed / overwritten per step.
    x_chunk = x_ref[...].reshape(tc_blk * bp, ip)
    xproj = jnp.dot(x_chunk.astype(mat_dtype), wx_ref[...],
                    preferred_element_type=jnp.float32)
    hseq_ref[...] = xproj.reshape(tc_blk, bp, hp)

    # ---- serial recurrence over the chunk (fully unrolled inner loop) -----
    def step(t, carry):
        h, m = carry                         # (Bp, Hp), (Bp, Dp) fp32
        x_t = x_ref[t]                       # (Bp, Ip) VMEM read (no HBM)

        # u = x.enc_x + h.enc_h + m.enc_m  (VPU multiply + XLU lane reduce)
        u = (jnp.sum(x_t * encx_ref[...], axis=-1, keepdims=True)
             + jnp.sum(h * ench_ref[...], axis=-1, keepdims=True)
             + jnp.sum(m * encm_ref[...], axis=-1, keepdims=True))  # (Bp, 1)

        # m' = m @ (A^T + I) + u * B^T   (identity folded at prep time)
        # TODO(synk): on v5e, replace this fp32 MXU matmul with a
        # broadcast-multiply + lane reduce (or bf16 + correction) for small D.
        m_new = (jnp.dot(m, adt_ref[...], preferred_element_type=jnp.float32)
                 + u * bt_ref[...])

        # h' = tanh(x@Wx^T (precomputed) + h@Wh^T + m'@Wm^T) -- no concats,
        # memory path kept fp32.
        pre = (hseq_ref[t]
               + jnp.dot(h.astype(mat_dtype), wh_ref[...],
                         preferred_element_type=jnp.float32)
               + jnp.dot(m_new, wm_ref[...],
                         preferred_element_type=jnp.float32))
        h_new = jnp.tanh(pre)

        if t_total % tc_blk != 0:            # static: only trace when padded
            valid = (c * tc_blk + t) < t_total
            h_new = jnp.where(valid, h_new, h)
            m_new = jnp.where(valid, m_new, m)

        hseq_ref[pl.ds(t, 1)] = h_new[None]  # overwrite xproj slab with h_t
        return h_new, m_new

    h_fin, m_fin = lax.fori_loop(0, tc_blk, step, (h_sc[...], m_sc[...]),
                                 unroll=True)

    # Carry state across chunks; write final-state outputs (resident blocks).
    h_sc[...] = h_fin
    m_sc[...] = m_fin
    hfin_ref[...] = h_fin
    mfin_ref[...] = m_fin


# ---------------------------------------------------------------------------
# One-time parameter repacking (transposes / padding / identity-fold hoisted
# out of the per-call path).
# ---------------------------------------------------------------------------
def _round_up(n, mult):
    return ((n + mult - 1) // mult) * mult


def _pad_axis(a, target, axis):
    pad = target - a.shape[axis]
    if pad == 0:
        return a
    widths = [(0, 0)] * a.ndim
    widths[axis] = (0, pad)
    return jnp.pad(a, widths)


def prepare_kernel_params(params, matmul_dtype=jnp.float32):
    I = params["input_kernel"].shape[1]
    H = params["input_kernel"].shape[0]
    D = params["AT"].shape[0]
    Ip, Hp, Dp = _round_up(I, 128), _round_up(H, 128), _round_up(D, 128)

    def pad2(w, r, c):
        return _pad_axis(_pad_axis(w, r, 0), c, 1)

    return dict(
        # encoders (fp32)
        enc_x=_pad_axis(params["input_encoders"], Ip, 1).astype(jnp.float32),
        enc_h=_pad_axis(params["hidden_encoders"], Hp, 1).astype(jnp.float32),
        enc_m=_pad_axis(params["memory_encoders"], Dp, 1).astype(jnp.float32),
        # h-path kernels, transposed for right-multiplication
        w_x=pad2(params["input_kernel"].T, Ip, Hp).astype(matmul_dtype),
        w_h=pad2(params["hidden_kernel"].T, Hp, Hp).astype(matmul_dtype),
        # memory-path kernel stays fp32 (precision-sensitive Legendre state)
        w_m=pad2(params["memory_kernel"].T, Dp, Hp).astype(jnp.float32),
        # AdT = A^T + I folded at prep time; BT^T
        adt=pad2(params["AT"].T + jnp.eye(D, dtype=jnp.float32),
                 Dp, Dp).astype(jnp.float32),
        bt=pad2(params["BT"].T, 1, Dp).astype(jnp.float32),
        I=I, H=H, D=D, Ip=Ip, Hp=Hp, Dp=Dp,
    )


# ---------------------------------------------------------------------------
# Wrappers.
# ---------------------------------------------------------------------------
def _vmem_limit_bytes(Tc, Bp, Ip, Hp, Dp, mat_bytes):
    f32 = 4
    streamed = 2 * Tc * Bp * (Ip + Hp) * f32                # x in + h_seq out
    weights = 2 * ((Ip * Hp + Hp * Hp) * mat_bytes          # Wx, Wh
                   + (Dp * Hp + Dp * Dp) * f32              # Wm, AdT
                   + (Ip + Hp + 2 * Dp) * f32               # encoders + B^T
                   + (Bp * Hp + Bp * Dp) * f32)             # h0 / m0
    outs = 2 * (Bp * Hp + Bp * Dp) * f32                    # hfin / mfin
    scratch = (Bp * Hp + Bp * Dp) * f32                     # state scratch
    est = streamed + weights + outs + scratch
    # 2x margin for compiler temporaries; keep headroom under v7x's 64 MiB.
    return int(min(max(2 * est, 16 * 1024 * 1024), 56 * 1024 * 1024))


def lmu_scan(xs, h0, m0, kp, tc=16):
    """Run the LMU cell over a whole (T, B, I) sequence in ONE pallas_call.
    Returns (h_seq (T,B,H), h_T (B,H), m_T (B,D))."""
    T, B, _ = xs.shape
    Ip, Hp, Dp = kp["Ip"], kp["Hp"], kp["Dp"]
    H, D = kp["H"], kp["D"]

    mat_bytes = kp["w_x"].dtype.itemsize
    sub = 16 if mat_bytes < 4 else 8          # bf16 sublane packing
    Bp = _round_up(max(B, sub), sub)

    Tc = max(1, min(tc, T))
    n_chunks = -(-T // Tc)
    Tp = n_chunks * Tc

    xs_p = _pad_axis(_pad_axis(_pad_axis(xs.astype(jnp.float32), Tp, 0),
                               Bp, 1), Ip, 2)
    h0_p = _pad_axis(_pad_axis(h0.astype(jnp.float32), Bp, 0), Hp, 1)
    m0_p = _pad_axis(_pad_axis(m0.astype(jnp.float32), Bp, 0), Dp, 1)

    def resident(shape):   # constant block index -> DMA'd once, stays in VMEM
        return pl.BlockSpec(shape, lambda c: (0,) * len(shape))

    # TODO(synk): on v7x, single-buffer the resident weight blocks
    # (pl.Buffered(1) / manual DMA) and add a "parallel" batch- or Hp-tile
    # grid axis so the second TensorCore is used once shapes warrant it.
    kernel = partial(lmu_seq_kernel, t_total=T)

    h_seq_p, h_fin_p, m_fin_p = pl.pallas_call(
        kernel,
        out_shape=(jax.ShapeDtypeStruct((Tp, Bp, Hp), jnp.float32),
                   jax.ShapeDtypeStruct((Bp, Hp), jnp.float32),
                   jax.ShapeDtypeStruct((Bp, Dp), jnp.float32)),
        grid_spec=pltpu.PrefetchScalarGridSpec(
            num_scalar_prefetch=0,
            grid=(n_chunks,),
            in_specs=[
                pl.BlockSpec((Tc, Bp, Ip), lambda c: (c, 0, 0)),  # x chunk
                resident((Bp, Hp)),           # h0
                resident((Bp, Dp)),           # m0
                resident((1, Ip)),            # enc_x
                resident((1, Hp)),            # enc_h
                resident((1, Dp)),            # enc_m
                resident((Ip, Hp)),           # Wx^T
                resident((Hp, Hp)),           # Wh^T
                resident((Dp, Hp)),           # Wm^T (fp32)
                resident((Dp, Dp)),           # A^T + I
                resident((1, Dp)),            # B^T
            ],
            out_specs=(
                pl.BlockSpec((Tc, Bp, Hp), lambda c: (c, 0, 0)),  # h per chunk
                resident((Bp, Hp)),           # h_T
                resident((Bp, Dp)),           # m_T
            ),
            scratch_shapes=[pltpu.VMEM((Bp, Hp), jnp.float32),    # h state
                            pltpu.VMEM((Bp, Dp), jnp.float32)],   # m state
        ),
        compiler_params=pltpu.CompilerParams(
            dimension_semantics=("arbitrary",),   # recurrent chunk axis
            vmem_limit_bytes=_vmem_limit_bytes(Tc, Bp, Ip, Hp, Dp, mat_bytes),
        ),
    )(xs_p, h0_p, m0_p, kp["enc_x"], kp["enc_h"], kp["enc_m"],
      kp["w_x"], kp["w_h"], kp["w_m"], kp["adt"], kp["bt"])

    return h_seq_p[:T, :B, :H], h_fin_p[:B, :H], m_fin_p[:B, :D]


def lmu_cell(x, h, m, kp):
    """One LMUCell.forward step (T=1 specialization of the fused kernel)."""
    _, h_new, m_new = lmu_scan(x[None], h, m, kp, tc=1)
    return h_new, m_new


# ---------------------------------------------------------------------------
# Parameter construction (deterministic, mirrors LMUCell.__init__).
# ---------------------------------------------------------------------------
def legendre_delay_zoh(order, theta, dt=1.0):
    """LegendreDelay (A, B), ZOH-discretized; returns (Ad - I, Bd) exactly as
    LMUCell stores them in AT / BT."""
    Q = np.arange(order, dtype=np.float64)
    R = (2.0 * Q + 1.0)[:, None] / theta
    j, i = np.meshgrid(Q, Q)
    A = np.where(i < j, -1.0, (-1.0) ** (i - j + 1)) * R          # (D, D)
    B = ((-1.0) ** Q)[:, None] * R                                # (D, 1)
    M = np.zeros((order + 1, order + 1), dtype=np.float64)
    M[:order, :order] = A * dt
    M[:order, order:] = B * dt
    EM = np.asarray(jax.scipy.linalg.expm(jnp.asarray(M)))
    Ad = EM[:order, :order]
    Bd = EM[:order, order:]
    return Ad - np.eye(order), Bd


def lecun_uniform_init(key, shape):
    fan_in = shape[1]
    lim = math.sqrt(3.0 / fan_in)
    return jax.random.uniform(key, shape, jnp.float32, -lim, lim)


def xavier_normal_init(key, shape):
    fan_out, fan_in = shape  # torch weight layout (out, in)
    std = math.sqrt(2.0 / (fan_in + fan_out))
    return std * jax.random.normal(key, shape, jnp.float32)


def make_params(input_size, hidden_size, order, theta, key):
    k1, k2, k3, k4, k5 = jax.random.split(key, 5)
    AT_np, BT_np = legendre_delay_zoh(order, theta)
    return {
        "input_encoders": lecun_uniform_init(k1, (1, input_size)),
        "hidden_encoders": lecun_uniform_init(k2, (1, hidden_size)),
        "memory_encoders": jnp.zeros((1, order), jnp.float32),   # constant_(0)
        "input_kernel": xavier_normal_init(k3, (hidden_size, input_size)),
        "hidden_kernel": xavier_normal_init(k4, (hidden_size, hidden_size)),
        "memory_kernel": xavier_normal_init(k5, (hidden_size, order)),
        "AT": jnp.asarray(AT_np, jnp.float32),                   # (D, D)
        "BT": jnp.asarray(BT_np, jnp.float32),                   # (D, 1)
    }


# ---------------------------------------------------------------------------
# Pure-JAX reference (verbatim translation of LMUCell.forward + scan).
# ---------------------------------------------------------------------------
def lmu_cell_ref(x, h, m, p):
    u = (x @ p["input_encoders"].T
         + h @ p["hidden_encoders"].T
         + m @ p["memory_encoders"].T)
    m = m + m @ p["AT"].T + u @ p["BT"].T
    h = jnp.tanh(x @ p["input_kernel"].T
                 + h @ p["hidden_kernel"].T
                 + m @ p["memory_kernel"].T)
    return h, m


def lmu_scan_ref(xs, h0, m0, p):
    def step(carry, x):
        h, m = carry
        h, m = lmu_cell_ref(x, h, m, p)
        return (h, m), h
    (hT, mT), h_seq = lax.scan(step, (h0, m0), xs)
    return h_seq, hT, mT


if __name__ == "__main__":
    B, INPUT, HIDDEN, ORDER, THETA, T = 2, 4, 32, 8, 100, 16

    root = jax.random.PRNGKey(0)
    kparam, kx, kh, km = jax.random.split(root, 4)
    params = make_params(INPUT, HIDDEN, ORDER, THETA, kparam)

    xs = jax.random.normal(kx, (T, B, INPUT), jnp.float32)
    h0 = jax.random.normal(kh, (B, HIDDEN), jnp.float32)
    m0 = jax.random.normal(km, (B, ORDER), jnp.float32)

    # Reference: LMUCell.forward scanned over time.
    h_seq_ref, h_ref, m_ref = lmu_scan_ref(xs, h0, m0, params)

    # --- fp32 weights, two time chunks (Tc=8): tight match ------------------
    kp32 = prepare_kernel_params(params, matmul_dtype=jnp.float32)
    h_seq, hT, mT = lmu_scan(xs, h0, m0, kp32, tc=8)
    jax.block_until_ready((h_seq, hT, mT))
    np.testing.assert_allclose(np.asarray(h_seq), np.asarray(h_seq_ref),
                               rtol=1e-5, atol=1e-5)
    np.testing.assert_allclose(np.asarray(hT), np.asarray(h_ref),
                               rtol=1e-5, atol=1e-5)
    np.testing.assert_allclose(np.asarray(mT), np.asarray(m_ref),
                               rtol=1e-5, atol=1e-5)

    # --- ragged length (T=13, Tc=8): exercises the tail-mask path -----------
    hs13_ref, h13_ref, m13_ref = lmu_scan_ref(xs[:13], h0, m0, params)
    hs13, h13, m13 = lmu_scan(xs[:13], h0, m0, kp32, tc=8)
    jax.block_until_ready((hs13, h13, m13))
    np.testing.assert_allclose(np.asarray(hs13), np.asarray(hs13_ref),
                               rtol=1e-5, atol=1e-5)
    np.testing.assert_allclose(np.asarray(h13), np.asarray(h13_ref),
                               rtol=1e-5, atol=1e-5)
    np.testing.assert_allclose(np.asarray(m13), np.asarray(m13_ref),
                               rtol=1e-5, atol=1e-5)

    # --- single-step call (exact original-module forward semantics) ---------
    h1, m1 = lmu_cell(xs[0], h0, m0, kp32)
    h1_ref, m1_ref = lmu_cell_ref(xs[0], h0, m0, params)
    np.testing.assert_allclose(np.asarray(h1), np.asarray(h1_ref),
                               rtol=1e-5, atol=1e-5)
    np.testing.assert_allclose(np.asarray(m1), np.asarray(m1_ref),
                               rtol=1e-5, atol=1e-5)

    # --- bf16 Wx/Wh (memory path kept fp32), loose tolerance ----------------
    kpbf = prepare_kernel_params(params, matmul_dtype=jnp.bfloat16)
    h_seq_bf, hT_bf, mT_bf = lmu_scan(xs, h0, m0, kpbf, tc=8)
    jax.block_until_ready((h_seq_bf, hT_bf, mT_bf))
    np.testing.assert_allclose(np.asarray(hT_bf), np.asarray(h_ref),
                               rtol=1e-1, atol=1e-1)
    np.testing.assert_allclose(np.asarray(mT_bf), np.asarray(m_ref),
                               rtol=1e-1, atol=1e-1)

    print("KERNEL_OK")
</pallas_src>

<mosaic_0001>
module attributes {stable_mosaic.version = 11 : i64} {
  func.func @lmu_seq_kernel(%arg0: i32, %arg1: memref<8x8x128xf32, #tpu.memory_space<vmem>>, %arg2: memref<8x128xf32, #tpu.memory_space<vmem>>, %arg3: memref<8x128xf32, #tpu.memory_space<vmem>>, %arg4: memref<1x128xf32, #tpu.memory_space<vmem>>, %arg5: memref<1x128xf32, #tpu.memory_space<vmem>>, %arg6: memref<1x128xf32, #tpu.memory_space<vmem>>, %arg7: memref<128x128xf32, #tpu.memory_space<vmem>>, %arg8: memref<128x128xf32, #tpu.memory_space<vmem>>, %arg9: memref<128x128xf32, #tpu.memory_space<vmem>>, %arg10: memref<128x128xf32, #tpu.memory_space<vmem>>, %arg11: memref<1x128xf32, #tpu.memory_space<vmem>>, %arg12: memref<8x8x128xf32, #tpu.memory_space<vmem>>, %arg13: memref<8x128xf32, #tpu.memory_space<vmem>>, %arg14: memref<8x128xf32, #tpu.memory_space<vmem>>, %arg15: memref<8x128xf32, #tpu.memory_space<vmem>>, %arg16: memref<8x128xf32, #tpu.memory_space<vmem>>) attributes {dimension_semantics = [#tpu.dimension_semantics<arbitrary>], iteration_bounds = array<i64: 2>, scalar_prefetch = 0 : i64, scratch_operands = 2 : i64, tpu.core_type = #tpu.core_type<tc>, window_params = [{transform_indices = @transform_0, window_bounds = array<i64: 8, 8, 128>}, {pipeline_mode = #tpu.pipeline_mode<synchronous>, transform_indices = @transform_1, window_bounds = array<i64: 8, 128>}, {pipeline_mode = #tpu.pipeline_mode<synchronous>, transform_indices = @transform_2, window_bounds = array<i64: 8, 128>}, {pipeline_mode = #tpu.pipeline_mode<synchronous>, transform_indices = @transform_3, window_bounds = array<i64: 1, 128>}, {pipeline_mode = #tpu.pipeline_mode<synchronous>, transform_indices = @transform_4, window_bounds = array<i64: 1, 128>}, {pipeline_mode = #tpu.pipeline_mode<synchronous>, transform_indices = @transform_5, window_bounds = array<i64: 1, 128>}, {pipeline_mode = #tpu.pipeline_mode<synchronous>, transform_indices = @transform_6, window_bounds = array<i64: 128, 128>}, {pipeline_mode = #tpu.pipeline_mode<synchronous>, transform_indices = @transform_7, window_bounds = array<i64: 128, 128>}, {pipeline_mode = #tpu.pipeline_mode<synchronous>, transform_indices = @transform_8, window_bounds = array<i64: 128, 128>}, {pipeline_mode = #tpu.pipeline_mode<synchronous>, transform_indices = @transform_9, window_bounds = array<i64: 128, 128>}, {pipeline_mode = #tpu.pipeline_mode<synchronous>, transform_indices = @transform_10, window_bounds = array<i64: 1, 128>}, {transform_indices = @transform_11, window_bounds = array<i64: 8, 8, 128>}, {pipeline_mode = #tpu.pipeline_mode<synchronous>, transform_indices = @transform_12, window_bounds = array<i64: 8, 128>}, {pipeline_mode = #tpu.pipeline_mode<synchronous>, transform_indices = @transform_13, window_bounds = array<i64: 8, 128>}]} {
    %c0_i32 = arith.constant 0 : i32
    %0 = arith.cmpi eq, %arg0, %c0_i32 : i32
    %1 = arith.extui %0 : i1 to i32
    %c0_i32_0 = arith.constant 0 : i32
    %2 = arith.cmpi ne, %1, %c0_i32_0 : i32
    scf.if %2 {
      %c0_229 = arith.constant 0 : index
      %c0_230 = arith.constant 0 : index
      %335 = vector.load %arg2[%c0_229, %c0_230] : memref<8x128xf32, #tpu.memory_space<vmem>>, vector<8x128xf32>
      %c0_231 = arith.constant 0 : index
      %c0_232 = arith.constant 0 : index
      %336 = vector.load %arg15[%c0_231, %c0_232] : memref<8x128xf32, #tpu.memory_space<vmem>>, vector<8x128xf32>
      tpu.vector_store %arg15[%c0_231, %c0_232], %335 {strides = array<i32>} : memref<8x128xf32, #tpu.memory_space<vmem>>, vector<8x128xf32>,
      %c0_233 = arith.constant 0 : index
      %c0_234 = arith.constant 0 : index
      %337 = vector.load %arg3[%c0_233, %c0_234] : memref<8x128xf32, #tpu.memory_space<vmem>>, vector<8x128xf32>
      %c0_235 = arith.constant 0 : index
      %c0_236 = arith.constant 0 : index
      %338 = vector.load %arg16[%c0_235, %c0_236] : memref<8x128xf32, #tpu.memory_space<vmem>>, vector<8x128xf32>
      tpu.vector_store %arg16[%c0_235, %c0_236], %337 {strides = array<i32>} : memref<8x128xf32, #tpu.memory_space<vmem>>, vector<8x128xf32>,
    } else {
    }
    %c0 = arith.constant 0 : index
    %c0_1 = arith.constant 0 : index
    %c0_2 = arith.constant 0 : index
    %3 = vector.load %arg1[%c0, %c0_1, %c0_2] : memref<8x8x128xf32, #tpu.memory_space<vmem>>, vector<8x8x128xf32>
    %4 = vector.shape_cast %3 : vector<8x8x128xf32> to vector<64x128xf32>
    %c0_3 = arith.constant 0 : index
    %c0_4 = arith.constant 0 : index
    %5 = vector.load %arg7[%c0_3, %c0_4] : memref<128x128xf32, #tpu.memory_space<vmem>>, vector<128x128xf32>
    %cst = arith.constant dense<0.000000e+00> : vector<64x128xf32>
    %6 = tpu.matmul %4, %5, %cst {dimension_numbers = #tpu.dot_dimension_numbers<[1], [0], [0], [1], [0, 0, 1, 1], [], []>} : vector<64x128xf32>, vector<128x128xf32>, vector<64x128xf32> -> vector<64x128xf32>
    %7 = vector.shape_cast %6 : vector<64x128xf32> to vector<8x8x128xf32>
    %c0_5 = arith.constant 0 : index
    %c0_6 = arith.constant 0 : index
    %c0_7 = arith.constant 0 : index
    %8 = vector.load %arg12[%c0_5, %c0_6, %c0_7] : memref<8x8x128xf32, #tpu.memory_space<vmem>>, vector<8x8x128xf32>
    tpu.vector_store %arg12[%c0_5, %c0_6, %c0_7], %7 {strides = array<i32>} : memref<8x8x128xf32, #tpu.memory_space<vmem>>, vector<8x8x128xf32>,
    %c0_8 = arith.constant 0 : index
    %c0_9 = arith.constant 0 : index
    %9 = vector.load %arg15[%c0_8, %c0_9] : memref<8x128xf32, #tpu.memory_space<vmem>>, vector<8x128xf32>
    %c0_10 = arith.constant 0 : index
    %c0_11 = arith.constant 0 : index
    %10 = vector.load %arg16[%c0_10, %c0_11] : memref<8x128xf32, #tpu.memory_space<vmem>>, vector<8x128xf32>
    %c0_i32_12 = arith.constant 0 : i32
    %11 = arith.index_cast %c0_i32_12 : i32 to index
    %c0_13 = arith.constant 0 : index
    %c0_14 = arith.constant 0 : index
    %12 = vector.load %arg1[%11, %c0_13, %c0_14] : memref<8x8x128xf32, #tpu.memory_space<vmem>>, vector<1x8x128xf32>
    %13 = vector.shape_cast %12 : vector<1x8x128xf32> to vector<8x128xf32>
    %c0_15 = arith.constant 0 : index
    %c0_16 = arith.constant 0 : index
    %14 = vector.load %arg4[%c0_15, %c0_16] : memref<1x128xf32, #tpu.memory_space<vmem>>, vector<1x128xf32>
    %15 = vector.broadcast %14 : vector<1x128xf32> to vector<8x128xf32>
    %16 = arith.mulf %13, %15 : vector<8x128xf32>
    %cst_17 = arith.constant dense<0.000000e+00> : vector<8xf32>
    %17 = vector.multi_reduction <add>, %16, %cst_17 [1] : vector<8x128xf32> to vector<8xf32>
    %18 = vector.shape_cast %17 : vector<8xf32> to vector<8x1xf32>
    %c0_18 = arith.constant 0 : index
    %c0_19 = arith.constant 0 : index
    %19 = vector.load %arg5[%c0_18, %c0_19] : memref<1x128xf32, #tpu.memory_space<vmem>>, vector<1x128xf32>
    %20 = vector.broadcast %19 : vector<1x128xf32> to vector<8x128xf32>
    %21 = arith.mulf %9, %20 : vector<8x128xf32>
    %cst_20 = arith.constant dense<0.000000e+00> : vector<8xf32>
    %22 = vector.multi_reduction <add>, %21, %cst_20 [1] : vector<8x128xf32> to vector<8xf32>
    %23 = vector.shape_cast %22 : vector<8xf32> to vector<8x1xf32>
    %24 = arith.addf %18, %23 : vector<8x1xf32>
    %c0_21 = arith.constant 0 : index
    %c0_22 = arith.constant 0 : index
    %25 = vector.load %arg6[%c0_21, %c0_22] : memref<1x128xf32, #tpu.memory_space<vmem>>, vector<1x128xf32>
    %26 = vector.broadcast %25 : vector<1x128xf32> to vector<8x128xf32>
    %27 = arith.mulf %10, %26 : vector<8x128xf32>
    %cst_23 = arith.constant dense<0.000000e+00> : vector<8xf32>
    %28 = vector.multi_reduction <add>, %27, %cst_23 [1] : vector<8x128xf32> to vector<8xf32>
    %29 = vector.shape_cast %28 : vector<8xf32> to vector<8x1xf32>
    %30 = arith.addf %24, %29 : vector<8x1xf32>
    %c0_24 = arith.constant 0 : index
    %c0_25 = arith.constant 0 : index
    %31 = vector.load %arg10[%c0_24, %c0_25] : memref<128x128xf32, #tpu.memory_space<vmem>>, vector<128x128xf32>
    %cst_26 = arith.constant dense<0.000000e+00> : vector<8x128xf32>
    %32 = tpu.matmul %10, %31, %cst_26 {dimension_numbers = #tpu.dot_dimension_numbers<[1], [0], [0], [1], [0, 0, 1, 1], [], []>} : vector<8x128xf32>, vector<128x128xf32>, vector<8x128xf32> -> vector<8x128xf32>
    %c0_27 = arith.constant 0 : index
    %c0_28 = arith.constant 0 : index
    %33 = vector.load %arg11[%c0_27, %c0_28] : memref<1x128xf32, #tpu.memory_space<vmem>>, vector<1x128xf32>
    %34 = vector.broadcast %30 : vector<8x1xf32> to vector<8x128xf32>
    %35 = vector.broadcast %33 : vector<1x128xf32> to vector<8x128xf32>
    %36 = arith.mulf %34, %35 : vector<8x128xf32>
    %37 = arith.addf %32, %36 : vector<8x128xf32>
    %38 = arith.index_cast %c0_i32_12 : i32 to index
    %c0_29 = arith.constant 0 : index
    %c0_30 = arith.constant 0 : index
    %39 = vector.load %arg12[%38, %c0_29, %c0_30] : memref<8x8x128xf32, #tpu.memory_space<vmem>>, vector<1x8x128xf32>
    %40 = vector.shape_cast %39 : vector<1x8x128xf32> to vector<8x128xf32>
    %c0_31 = arith.constant 0 : index
    %c0_32 = arith.constant 0 : index
    %41 = vector.load %arg8[%c0_31, %c0_32] : memref<128x128xf32, #tpu.memory_space<vmem>>, vector<128x128xf32>
    %cst_33 = arith.constant dense<0.000000e+00> : vector<8x128xf32>
    %42 = tpu.matmul %9, %41, %cst_33 {dimension_numbers = #tpu.dot_dimension_numbers<[1], [0], [0], [1], [0, 0, 1, 1], [], []>} : vector<8x128xf32>, vector<128x128xf32>, vector<8x128xf32> -> vector<8x128xf32>
    %43 = arith.addf %40, %42 : vector<8x128xf32>
    %c0_34 = arith.constant 0 : index
    %c0_35 = arith.constant 0 : index
    %44 = vector.load %arg9[%c0_34, %c0_35] : memref<128x128xf32, #tpu.memory_space<vmem>>, vector<128x128xf32>
    %cst_36 = arith.constant dense<0.000000e+00> : vector<8x128xf32>
    %45 = tpu.matmul %37, %44, %cst_36 {dimension_numbers = #tpu.dot_dimension_numbers<[1], [0], [0], [1], [0, 0, 1, 1], [], []>} : vector<8x128xf32>, vector<128x128xf32>, vector<8x128xf32> -> vector<8x128xf32>
    %46 = arith.addf %43, %45 : vector<8x128xf32>
    %47 = math.tanh %46 : vector<8x128xf32>
    %48 = vector.shape_cast %47 : vector<8x128xf32> to vector<1x8x128xf32>
    %49 = arith.index_cast %c0_i32_12 : i32 to index
    %c0_37 = arith.constant 0 : index
    %c0_38 = arith.constant 0 : index
    %50 = vector.load %arg12[%49, %c0_37, %c0_38] : memref<8x8x128xf32, #tpu.memory_space<vmem>>, vector<1x8x128xf32>
    tpu.vector_store %arg12[%49, %c0_37, %c0_38], %48 {strides = array<i32>} : memref<8x8x128xf32, #tpu.memory_space<vmem>>, vector<1x8x128xf32>,
    %c1_i32 = arith.constant 1 : i32
    %51 = arith.index_cast %c1_i32 : i32 to index
    %c0_39 = arith.constant 0 : index
    %c0_40 = arith.constant 0 : index
    %52 = vector.load %arg1[%51, %c0_39, %c0_40] : memref<8x8x128xf32, #tpu.memory_space<vmem>>, vector<1x8x128xf32>
    %53 = vector.shape_cast %52 : vector<1x8x128xf32> to vector<8x128xf32>
    %c0_41 = arith.constant 0 : index
    %c0_42 = arith.constant 0 : index
    %54 = vector.load %arg4[%c0_41, %c0_42] : memref<1x128xf32, #tpu.memory_space<vmem>>, vector<1x128xf32>
    %55 = vector.broadcast %54 : vector<1x128xf32> to vector<8x128xf32>
    %56 = arith.mulf %53, %55 : vector<8x128xf32>
    %cst_43 = arith.constant dense<0.000000e+00> : vector<8xf32>
    %57 = vector.multi_reduction <add>, %56, %cst_43 [1] : vector<8x128xf32> to vector<8xf32>
    %58 = vector.shape_cast %57 : vector<8xf32> to vector<8x1xf32>
    %c0_44 = arith.constant 0 : index
    %c0_45 = arith.constant 0 : index
    %59 = vector.load %arg5[%c0_44, %c0_45] : memref<1x128xf32, #tpu.memory_space<vmem>>, vector<1x128xf32>
    %60 = vector.broadcast %59 : vector<1x128xf32> to vector<8x128xf32>
    %61 = arith.mulf %47, %60 : vector<8x128xf32>
    %cst_46 = arith.constant dense<0.000000e+00> : vector<8xf32>
    %62 = vector.multi_reduction <add>, %61, %cst_46 [1] : vector<8x128xf32> to vector<8xf32>
    %63 = vector.shape_cast %62 : vector<8xf32> to vector<8x1xf32>
    %64 = arith.addf %58, %63 : vector<8x1xf32>
    %c0_47 = arith.constant 0 : index
    %c0_48 = arith.constant 0 : index
    %65 = vector.load %arg6[%c0_47, %c0_48] : memref<1x128xf32, #tpu.memory_space<vmem>>, vector<1x128xf32>
    %66 = vector.broadcast %65 : vector<1x128xf32> to vector<8x128xf32>
    %67 = arith.mulf %37, %66 : vector<8x128xf32>
    %cst_49 = arith.constant dense<0.000000e+00> : vector<8xf32>
    %68 = vector.multi_reduction <add>, %67, %cst_49 [1] : vector<8x128xf32> to vector<8xf32>
    %69 = vector.shape_cast %68 : vector<8xf32> to vector<8x1xf32>
    %70 = arith.addf %64, %69 : vector<8x1xf32>
    %c0_50 = arith.constant 0 : index
    %c0_51 = arith.constant 0 : index
    %71 = vector.load %arg10[%c0_50, %c0_51] : memref<128x128xf32, #tpu.memory_space<vmem>>, vector<128x128xf32>
    %cst_52 = arith.constant dense<0.000000e+00> : vector<8x128xf32>
    %72 = tpu.matmul %37, %71, %cst_52 {dimension_numbers = #tpu.dot_dimension_numbers<[1], [0], [0], [1], [0, 0, 1, 1], [], []>} : vector<8x128xf32>, vector<128x128xf32>, vector<8x128xf32> -> vector<8x128xf32>
    %c0_53 = arith.constant 0 : index
    %c0_54 = arith.constant 0 : index
    %73 = vector.load %arg11[%c0_53, %c0_54] : memref<1x128xf32, #tpu.memory_space<vmem>>, vector<1x128xf32>
    %74 = vector.broadcast %70 : vector<8x1xf32> to vector<8x128xf32>
    %75 = vector.broadcast %73 : vector<1x128xf32> to vector<8x128xf32>
    %76 = arith.mulf %74, %75 : vector<8x128xf32>
    %77 = arith.addf %72, %76 : vector<8x128xf32>
    %78 = arith.index_cast %c1_i32 : i32 to index
    %c0_55 = arith.constant 0 : index
    %c0_56 = arith.constant 0 : index
    %79 = vector.load %arg12[%78, %c0_55, %c0_56] : memref<8x8x128xf32, #tpu.memory_space<vmem>>, vector<1x8x128xf32>
    %80 = vector.shape_cast %79 : vector<1x8x128xf32> to vector<8x128xf32>
    %c0_57 = arith.constant 0 : index
    %c0_58 = arith.constant 0 : index
    %81 = vector.load %arg8[%c0_57, %c0_58] : memref<128x128xf32, #tpu.memory_space<vmem>>, vector<128x128xf32>
    %cst_59 = arith.constant dense<0.000000e+00> : vector<8x128xf32>
    %82 = tpu.matmul %47, %81, %cst_59 {dimension_numbers = #tpu.dot_dimension_numbers<[1], [0], [0], [1], [0, 0, 1, 1], [], []>} : vector<8x128xf32>, vector<128x128xf32>, vector<8x128xf32> -> vector<8x128xf32>
    %83 = arith.addf %80, %82 : vector<8x128xf32>
    %c0_60 = arith.constant 0 : index
    %c0_61 = arith.constant 0 : index
    %84 = vector.load %arg9[%c0_60, %c0_61] : memref<128x128xf32, #tpu.memory_space<vmem>>, vector<128x128xf32>
    %cst_62 = arith.constant dense<0.000000e+00> : vector<8x128xf32>
    %85 = tpu.matmul %77, %84, %cst_62 {dimension_numbers = #tpu.dot_dimension_numbers<[1], [0], [0], [1], [0, 0, 1, 1], [], []>} : vector<8x128xf32>, vector<128x128xf32>, vector<8x128xf32> -> vector<8x128xf32>
    %86 = arith.addf %83, %85 : vector<8x128xf32>
    %87 = math.tanh %86 : vector<8x128xf32>
    %88 = vector.shape_cast %87 : vector<8x128xf32> to vector<1x8x128xf32>
    %89 = arith.index_cast %c1_i32 : i32 to index
    %c0_63 = arith.constant 0 : index
    %c0_64 = arith.constant 0 : index
    %90 = vector.load %arg12[%89, %c0_63, %c0_64] : memref<8x8x128xf32, #tpu.memory_space<vmem>>, vector<1x8x128xf32>
    tpu.vector_store %arg12[%89, %c0_63, %c0_64], %88 {strides = array<i32>} : memref<8x8x128xf32, #tpu.memory_space<vmem>>, vector<1x8x128xf32>,
    %c2_i32 = arith.constant 2 : i32
    %91 = arith.index_cast %c2_i32 : i32 to index
    %c0_65 = arith.constant 0 : index
    %c0_66 = arith.constant 0 : index
    %92 = vector.load %arg1[%91, %c0_65, %c0_66] : memref<8x8x128xf32, #tpu.memory_space<vmem>>, vector<1x8x128xf32>
    %93 = vector.shape_cast %92 : vector<1x8x128xf32> to vector<8x128xf32>
    %c0_67 = arith.constant 0 : index
    %c0_68 = arith.constant 0 : index
    %94 = vector.load %arg4[%c0_67, %c0_68] : memref<1x128xf32, #tpu.memory_space<vmem>>, vector<1x128xf32>
    %95 = vector.broadcast %94 : vector<1x128xf32> to vector<8x128xf32>
    %96 = arith.mulf %93, %95 : vector<8x128xf32>
    %cst_69 = arith.constant dense<0.000000e+00> : vector<8xf32>
    %97 = vector.multi_reduction <add>, %96, %cst_69 [1] : vector<8x128xf32> to vector<8xf32>
    %98 = vector.shape_cast %97 : vector<8xf32> to vector<8x1xf32>
    %c0_70 = arith.constant 0 : index
    %c0_71 = arith.constant 0 : index
    %99 = vector.load %arg5[%c0_70, %c0_71] : memref<1x128xf32, #tpu.memory_space<vmem>>, vector<1x128xf32>
    %100 = vector.broadcast %99 : vector<1x128xf32> to vector<8x128xf32>
    %101 = arith.mulf %87, %100 : vector<8x128xf32>
    %cst_72 = arith.constant dense<0.000000e+00> : vector<8xf32>
    %102 = vector.multi_reduction <add>, %101, %cst_72 [1] : vector<8x128xf32> to vector<8xf32>
    %103 = vector.shape_cast %102 : vector<8xf32> to vector<8x1xf32>
    %104 = arith.addf %98, %103 : vector<8x1xf32>
    %c0_73 = arith.constant 0 : index
    %c0_74 = arith.constant 0 : index
    %105 = vector.load %arg6[%c0_73, %c0_74] : memref<1x128xf32, #tpu.memory_space<vmem>>, vector<1x128xf32>
    %106 = vector.broadcast %105 : vector<1x128xf32> to vector<8x128xf32>
    %107 = arith.mulf %77, %106 : vector<8x128xf32>
    %cst_75 = arith.constant dense<0.000000e+00> : vector<8xf32>
    %108 = vector.multi_reduction <add>, %107, %cst_75 [1] : vector<8x128xf32> to vector<8xf32>
    %109 = vector.shape_cast %108 : vector<8xf32> to vector<8x1xf32>
    %110 = arith.addf %104, %109 : vector<8x1xf32>
    %c0_76 = arith.constant 0 : index
    %c0_77 = arith.constant 0 : index
    %111 = vector.load %arg10[%c0_76, %c0_77] : memref<128x128xf32, #tpu.memory_space<vmem>>, vector<128x128xf32>
    %cst_78 = arith.constant dense<0.000000e+00> : vector<8x128xf32>
    %112 = tpu.matmul %77, %111, %cst_78 {dimension_numbers = #tpu.dot_dimension_numbers<[1], [0], [0], [1], [0, 0, 1, 1], [], []>} : vector<8x128xf32>, vector<128x128xf32>, vector<8x128xf32> -> vector<8x128xf32>
    %c0_79 = arith.constant 0 : index
    %c0_80 = arith.constant 0 : index
    %113 = vector.load %arg11[%c0_79, %c0_80] : memref<1x128xf32, #tpu.memory_space<vmem>>, vector<1x128xf32>
    %114 = vector.broadcast %110 : vector<8x1xf32> to vector<8x128xf32>
    %115 = vector.broadcast %113 : vector<1x128xf32> to vector<8x128xf32>
    %116 = arith.mulf %114, %115 : vector<8x128xf32>
    %117 = arith.addf %112, %116 : vector<8x128xf32>
    %118 = arith.index_cast %c2_i32 : i32 to index
    %c0_81 = arith.constant 0 : index
    %c0_82 = arith.constant 0 : index
    %119 = vector.load %arg12[%118, %c0_81, %c0_82] : memref<8x8x128xf32, #tpu.memory_space<vmem>>, vector<1x8x128xf32>
    %120 = vector.shape_cast %119 : vector<1x8x128xf32> to vector<8x128xf32>
    %c0_83 = arith.constant 0 : index
    %c0_84 = arith.constant 0 : index
    %121 = vector.load %arg8[%c0_83, %c0_84] : memref<128x128xf32, #tpu.memory_space<vmem>>, vector<128x128xf32>
    %cst_85 = arith.constant dense<0.000000e+00> : vector<8x128xf32>
    %122 = tpu.matmul %87, %121, %cst_85 {dimension_numbers = #tpu.dot_dimension_numbers<[1], [0], [0], [1], [0, 0, 1, 1], [], []>} : vector<8x128xf32>, vector<128x128xf32>, vector<8x128xf32> -> vector<8x128xf32>
    %123 = arith.addf %120, %122 : vector<8x128xf32>
    %c0_86 = arith.constant 0 : index
    %c0_87 = arith.constant 0 : index
    %124 = vector.load %arg9[%c0_86, %c0_87] : memref<128x128xf32, #tpu.memory_space<vmem>>, vector<128x128xf32>
    %cst_88 = arith.constant dense<0.000000e+00> : vector<8x128xf32>
    %125 = tpu.matmul %117, %124, %cst_88 {dimension_numbers = #tpu.dot_dimension_numbers<[1], [0], [0], [1], [0, 0, 1, 1], [], []>} : vector<8x128xf32>, vector<128x128xf32>, vector<8x128xf32> -> vector<8x128xf32>
    %126 = arith.addf %123, %125 : vector<8x128xf32>
    %127 = math.tanh %126 : vector<8x128xf32>
    %128 = vector.shape_cast %127 : vector<8x128xf32> to vector<1x8x128xf32>
    %129 = arith.index_cast %c2_i32 : i32 to index
    %c0_89 = arith.constant 0 : index
    %c0_90 = arith.constant 0 : index
    %130 = vector.load %arg12[%129, %c0_89, %c0_90] : memref<8x8x128xf32, #tpu.memory_space<vmem>>, vector<1x8x128xf32>
    tpu.vector_store %arg12[%129, %c0_89, %c0_90], %128 {strides = array<i32>} : memref<8x8x128xf32, #tpu.memory_space<vmem>>, vector<1x8x128xf32>,
    %c3_i32 = arith.constant 3 : i32
    %131 = arith.index_cast %c3_i32 : i32 to index
    %c0_91 = arith.constant 0 : index
    %c0_92 = arith.constant 0 : index
    %132 = vector.load %arg1[%131, %c0_91, %c0_92] : memref<8x8x128xf32, #tpu.memory_space<vmem>>, vector<1x8x128xf32>
    %133 = vector.shape_cast %132 : vector<1x8x128xf32> to vector<8x128xf32>
    %c0_93 = arith.constant 0 : index
    %c0_94 = arith.constant 0 : index
    %134 = vector.load %arg4[%c0_93, %c0_94] : memref<1x128xf32, #tpu.memory_space<vmem>>, vector<1x128xf32>
    %135 = vector.broadcast %134 : vector<1x128xf32> to vector<8x128xf32>
    %136 = arith.mulf %133, %135 : vector<8x128xf32>
    %cst_95 = arith.constant dense<0.000000e+00> : vector<8xf32>
    %137 = vector.multi_reduction <add>, %136, %cst_95 [1] : vector<8x128xf32> to vector<8xf32>
    %138 = vector.shape_cast %137 : vector<8xf32> to vector<8x1xf32>
    %c0_96 = arith.constant 0 : index
    %c0_97 = arith.constant 0 : index
    %139 = vector.load %arg5[%c0_96, %c0_97] : memref<1x128xf32, #tpu.memory_space<vmem>>, vector<1x128xf32>
    %140 = vector.broadcast %139 : vector<1x128xf32> to vector<8x128xf32>
    %141 = arith.mulf %127, %140 : vector<8x128xf32>
    %cst_98 = arith.constant dense<0.000000e+00> : vector<8xf32>
    %142 = vector.multi_reduction <add>, %141, %cst_98 [1] : vector<8x128xf32> to vector<8xf32>
    %143 = vector.shape_cast %142 : vector<8xf32> to vector<8x1xf32>
    %144 = arith.addf %138, %143 : vector<8x1xf32>
    %c0_99 = arith.constant 0 : index
    %c0_100 = arith.constant 0 : index
    %145 = vector.load %arg6[%c0_99, %c0_100] : memref<1x128xf32, #tpu.memory_space<vmem>>, vector<1x128xf32>
    %146 = vector.broadcast %145 : vector<1x128xf32> to vector<8x128xf32>
    %147 = arith.mulf %117, %146 : vector<8x128xf32>
    %cst_101 = arith.constant dense<0.000000e+00> : vector<8xf32>
    %148 = vector.multi_reduction <add>, %147, %cst_101 [1] : vector<8x128xf32> to vector<8xf32>
    %149 = vector.shape_cast %148 : vector<8xf32> to vector<8x1xf32>
    %150 = arith.addf %144, %149 : vector<8x1xf32>
    %c0_102 = arith.constant 0 : index
    %c0_103 = arith.constant 0 : index
    %151 = vector.load %arg10[%c0_102, %c0_103] : memref<128x128xf32, #tpu.memory_space<vmem>>, vector<128x128xf32>
    %cst_104 = arith.constant dense<0.000000e+00> : vector<8x128xf32>
    %152 = tpu.matmul %117, %151, %cst_104 {dimension_numbers = #tpu.dot_dimension_numbers<[1], [0], [0], [1], [0, 0, 1, 1], [], []>} : vector<8x128xf32>, vector<128x128xf32>, vector<8x128xf32> -> vector<8x128xf32>
    %c0_105 = arith.constant 0 : index
    %c0_106 = arith.constant 0 : index
    %153 = vector.load %arg11[%c0_105, %c0_106] : memref<1x128xf32, #tpu.memory_space<vmem>>, vector<1x128xf32>
    %154 = vector.broadcast %150 : vector<8x1xf32> to vector<8x128xf32>
    %155 = vector.broadcast %153 : vector<1x128xf32> to vector<8x128xf32>
    %156 = arith.mulf %154, %155 : vector<8x128xf32>
    %157 = arith.addf %152, %156 : vector<8x128xf32>
    %158 = arith.index_cast %c3_i32 : i32 to index
    %c0_107 = arith.constant 0 : index
    %c0_108 = arith.constant 0 : index
    %159 = vector.load %arg12[%158, %c0_107, %c0_108] : memref<8x8x128xf32, #tpu.memory_space<vmem>>, vector<1x8x128xf32>
    %160 = vector.shape_cast %159 : vector<1x8x128xf32> to vector<8x128xf32>
    %c0_109 = arith.constant 0 : index
    %c0_110 = arith.constant 0 : index
    %161 = vector.load %arg8[%c0_109, %c0_110] : memref<128x128xf32, #tpu.memory_space<vmem>>, vector<128x128xf32>
    %cst_111 = arith.constant dense<0.000000e+00> : vector<8x128xf32>
    %162 = tpu.matmul %127, %161, %cst_111 {dimension_numbers = #tpu.dot_dimension_numbers<[1], [0], [0], [1], [0, 0, 1, 1], [], []>} : vector<8x128xf32>, vector<128x128xf32>, vector<8x128xf32> -> vector<8x128xf32>
    %163 = arith.addf %160, %162 : vector<8x128xf32>
    %c0_112 = arith.constant 0 : index
    %c0_113 = arith.constant 0 : index
    %164 = vector.load %arg9[%c0_112, %c0_113] : memref<128x128xf32, #tpu.memory_space<vmem>>, vector<128x128xf32>
    %cst_114 = arith.constant dense<0.000000e+00> : vector<8x128xf32>
    %165 = tpu.matmul %157, %164, %cst_114 {dimension_numbers = #tpu.dot_dimension_numbers<[1], [0], [0], [1], [0, 0, 1, 1], [], []>} : vector<8x128xf32>, vector<128x128xf32>, vector<8x128xf32> -> vector<8x128xf32>
    %166 = arith.addf %163, %165 : vector<8x128xf32>
    %167 = math.tanh %166 : vector<8x128xf32>
    %168 = vector.shape_cast %167 : vector<8x128xf32> to vector<1x8x128xf32>
    %169 = arith.index_cast %c3_i32 : i32 to index
    %c0_115 = arith.constant 0 : index
    %c0_116 = arith.constant 0 : index
    %170 = vector.load %arg12[%169, %c0_115, %c0_116] : memref<8x8x128xf32, #tpu.memory_space<vmem>>, vector<1x8x128xf32>
    tpu.vector_store %arg12[%169, %c0_115, %c0_116], %168 {strides = array<i32>} : memref<8x8x128xf32, #tpu.memory_space<vmem>>, vector<1x8x128xf32>,
    %c4_i32 = arith.constant 4 : i32
    %171 = arith.index_cast %c4_i32 : i32 to index
    %c0_117 = arith.constant 0 : index
    %c0_118 = arith.constant 0 : index
    %172 = vector.load %arg1[%171, %c0_117, %c0_118] : memref<8x8x128xf32, #tpu.memory_space<vmem>>, vector<1x8x128xf32>
    %173 = vector.shape_cast %172 : vector<1x8x128xf32> to vector<8x128xf32>
    %c0_119 = arith.constant 0 : index
    %c0_120 = arith.constant 0 : index
    %174 = vector.load %arg4[%c0_119, %c0_120] : memref<1x128xf32, #tpu.memory_space<vmem>>, vector<1x128xf32>
    %175 = vector.broadcast %174 : vector<1x128xf32> to vector<8x128xf32>
    %176 = arith.mulf %173, %175 : vector<8x128xf32>
    %cst_121 = arith.constant dense<0.000000e+00> : vector<8xf32>
    %177 = vector.multi_reduction <add>, %176, %cst_121 [1] : vector<8x128xf32> to vector<8xf32>
    %178 = vector.shape_cast %177 : vector<8xf32> to vector<8x1xf32>
    %c0_122 = arith.constant 0 : index
    %c0_123 = arith.constant 0 : index
    %179 = vector.load %arg5[%c0_122, %c0_123] : memref<1x128xf32, #tpu.memory_space<vmem>>, vector<1x128xf32>
    %180 = vector.broadcast %179 : vector<1x128xf32> to vector<8x128xf32>
    %181 = arith.mulf %167, %180 : vector<8x128xf32>
    %cst_124 = arith.constant dense<0.000000e+00> : vector<8xf32>
    %182 = vector.multi_reduction <add>, %181, %cst_124 [1] : vector<8x128xf32> to vector<8xf32>
    %183 = vector.shape_cast %182 : vector<8xf32> to vector<8x1xf32>
    %184 = arith.addf %178, %183 : vector<8x1xf32>
    %c0_125 = arith.constant 0 : index
    %c0_126 = arith.constant 0 : index
    %185 = vector.load %arg6[%c0_125, %c0_126] : memref<1x128xf32, #tpu.memory_space<vmem>>, vector<1x128xf32>
    %186 = vector.broadcast %185 : vector<1x128xf32> to vector<8x128xf32>
    %187 = arith.mulf %157, %186 : vector<8x128xf32>
    %cst_127 = arith.constant dense<0.000000e+00> : vector<8xf32>
    %188 = vector.multi_reduction <add>, %187, %cst_127 [1] : vector<8x128xf32> to vector<8xf32>
    %189 = vector.shape_cast %188 : vector<8xf32> to vector<8x1xf32>
    %190 = arith.addf %184, %189 : vector<8x1xf32>
    %c0_128 = arith.constant 0 : index
    %c0_129 = arith.constant 0 : index
    %191 = vector.load %arg10[%c0_128, %c0_129] : memref<128x128xf32, #tpu.memory_space<vmem>>, vector<128x128xf32>
    %cst_130 = arith.constant dense<0.000000e+00> : vector<8x128xf32>
    %192 = tpu.matmul %157, %191, %cst_130 {dimension_numbers = #tpu.dot_dimension_numbers<[1], [0], [0], [1], [0, 0, 1, 1], [], []>} : vector<8x128xf32>, vector<128x128xf32>, vector<8x128xf32> -> vector<8x128xf32>
    %c0_131 = arith.constant 0 : index
    %c0_132 = arith.constant 0 : index
    %193 = vector.load %arg11[%c0_131, %c0_132] : memref<1x128xf32, #tpu.memory_space<vmem>>, vector<1x128xf32>
    %194 = vector.broadcast %190 : vector<8x1xf32> to vector<8x128xf32>
    %195 = vector.broadcast %193 : vector<1x128xf32> to vector<8x128xf32>
    %196 = arith.mulf %194, %195 : vector<8x128xf32>
    %197 = arith.addf %192, %196 : vector<8x128xf32>
    %198 = arith.index_cast %c4_i32 : i32 to index
    %c0_133 = arith.constant 0 : index
    %c0_134 = arith.constant 0 : index
    %199 = vector.load %arg12[%198, %c0_133, %c0_134] : memref<8x8x128xf32, #tpu.memory_space<vmem>>, vector<1x8x128xf32>
    %200 = vector.shape_cast %199 : vector<1x8x128xf32> to vector<8x128xf32>
    %c0_135 = arith.constant 0 : index
    %c0_136 = arith.constant 0 : index
    %201 = vector.load %arg8[%c0_135, %c0_136] : memref<128x128xf32, #tpu.memory_space<vmem>>, vector<128x128xf32>
    %cst_137 = arith.constant dense<0.000000e+00> : vector<8x128xf32>
    %202 = tpu.matmul %167, %201, %cst_137 {dimension_numbers = #tpu.dot_dimension_numbers<[1], [0], [0], [1], [0, 0, 1, 1], [], []>} : vector<8x128xf32>, vector<128x128xf32>, vector<8x128xf32> -> vector<8x128xf32>
    %203 = arith.addf %200, %202 : vector<8x128xf32>
    %c0_138 = arith.constant 0 : index
    %c0_139 = arith.constant 0 : index
    %204 = vector.load %arg9[%c0_138, %c0_139] : memref<128x128xf32, #tpu.memory_space<vmem>>, vector<128x128xf32>
    %cst_140 = arith.constant dense<0.000000e+00> : vector<8x128xf32>
    %205 = tpu.matmul %197, %204, %cst_140 {dimension_numbers = #tpu.dot_dimension_numbers<[1], [0], [0], [1], [0, 0, 1, 1], [], []>} : vector<8x128xf32>, vector<128x128xf32>, vector<8x128xf32> -> vector<8x128xf32>
    %206 = arith.addf %203, %205 : vector<8x128xf32>
    %207 = math.tanh %206 : vector<8x128xf32>
    %208 = vector.shape_cast %207 : vector<8x128xf32> to vector<1x8x128xf32>
    %209 = arith.index_cast %c4_i32 : i32 to index
    %c0_141 = arith.constant 0 : index
    %c0_142 = arith.constant 0 : index
    %210 = vector.load %arg12[%209, %c0_141, %c0_142] : memref<8x8x128xf32, #tpu.memory_space<vmem>>, vector<1x8x128xf32>
    tpu.vector_store %arg12[%209, %c0_141, %c0_142], %208 {strides = array<i32>} : memref<8x8x128xf32, #tpu.memory_space<vmem>>, vector<1x8x128xf32>,
    %c5_i32 = arith.constant 5 : i32
    %211 = arith.index_cast %c5_i32 : i32 to index
    %c0_143 = arith.constant 0 : index
    %c0_144 = arith.constant 0 : index
    %212 = vector.load %arg1[%211, %c0_143, %c0_144] : memref<8x8x128xf32, #tpu.memory_space<vmem>>, vector<1x8x128xf32>
    %213 = vector.shape_cast %212 : vector<1x8x128xf32> to vector<8x128xf32>
    %c0_145 = arith.constant 0 : index
    %c0_146 = arith.constant 0 : index
    %214 = vector.load %arg4[%c0_145, %c0_146] : memref<1x128xf32, #tpu.memory_space<vmem>>, vector<1x128xf32>
    %215 = vector.broadcast %214 : vector<1x128xf32> to vector<8x128xf32>
    %216 = arith.mulf %213, %215 : vector<8x128xf32>
    %cst_147 = arith.constant dense<0.000000e+00> : vector<8xf32>
    %217 = vector.multi_reduction <add>, %216, %cst_147 [1] : vector<8x128xf32> to vector<8xf32>
    %218 = vector.shape_cast %217 : vector<8xf32> to vector<8x1xf32>
    %c0_148 = arith.constant 0 : index
    %c0_149 = arith.constant 0 : index
    %219 = vector.load %arg5[%c0_148, %c0_149] : memref<1x128xf32, #tpu.memory_space<vmem>>, vector<1x128xf32>
    %220 = vector.broadcast %219 : vector<1x128xf32> to vector<8x128xf32>
    %221 = arith.mulf %207, %220 : vector<8x128xf32>
    %cst_150 = arith.constant dense<0.000000e+00> : vector<8xf32>
    %222 = vector.multi_reduction <add>, %221, %cst_150 [1] : vector<8x128xf32> to vector<8xf32>
    %223 = vector.shape_cast %222 : vector<8xf32> to vector<8x1xf32>
    %224 = arith.addf %218, %223 : vector<8x1xf32>
    %c0_151 = arith.constant 0 : index
    %c0_152 = arith.constant 0 : index
    %225 = vector.load %arg6[%c0_151, %c0_152] : memref<1x128xf32, #tpu.memory_space<vmem>>, vector<1x128xf32>
    %226 = vector.broadcast %225 : vector<1x128xf32> to vector<8x128xf32>
    %227 = arith.mulf %197, %226 : vector<8x128xf32>
    %cst_153 = arith.constant dense<0.000000e+00> : vector<8xf32>
    %228 = vector.multi_reduction <add>, %227, %cst_153 [1] : vector<8x128xf32> to vector<8xf32>
    %229 = vector.shape_cast %228 : vector<8xf32> to vector<8x1xf32>
    %230 = arith.addf %224, %229 : vector<8x1xf32>
    %c0_154 = arith.constant 0 : index
    %c0_155 = arith.constant 0 : index
    %231 = vector.load %arg10[%c0_154, %c0_155] : memref<128x128xf32, #tpu.memory_space<vmem>>, vector<128x128xf32>
    %cst_156 = arith.constant dense<0.000000e+00> : vector<8x128xf32>
    %232 = tpu.matmul %197, %231, %cst_156 {dimension_numbers = #tpu.dot_dimension_numbers<[1], [0], [0], [1], [0, 0, 1, 1], [], []>} : vector<8x128xf32>, vector<128x128xf32>, vector<8x128xf32> -> vector<8x128xf32>
    %c0_157 = arith.constant 0 : index
    %c0_158 = arith.constant 0 : index
    %233 = vector.load %arg11[%c0_157, %c0_158] : memref<1x128xf32, #tpu.memory_space<vmem>>, vector<1x128xf32>
    %234 = vector.broadcast %230 : vector<8x1xf32> to vector<8x128xf32>
    %235 = vector.broadcast %233 : vector<1x128xf32> to vector<8x128xf32>
    %236 = arith.mulf %234, %235 : vector<8x128xf32>
    %237 = arith.addf %232, %236 : vector<8x128xf32>
    %238 = arith.index_cast %c5_i32 : i32 to index
    %c0_159 = arith.constant 0 : index
    %c0_160 = arith.constant 0 : index
    %239 = vector.load %arg12[%238, %c0_159, %c0_160] : memref<8x8x128xf32, #tpu.memory_space<vmem>>, vector<1x8x128xf32>
    %240 = vector.shape_cast %239 : vector<1x8x128xf32> to vector<8x128xf32>
    %c0_161 = arith.constant 0 : index
    %c0_162 = arith.constant 0 : index
    %241 = vector.load %arg8[%c0_161, %c0_162] : memref<128x128xf32, #tpu.memory_space<vmem>>, vector<128x128xf32>
    %cst_163 = arith.constant dense<0.000000e+00> : vector<8x128xf32>
    %242 = tpu.matmul %207, %241, %cst_163 {dimension_numbers = #tpu.dot_dimension_numbers<[1], [0], [0], [1], [0, 0, 1, 1], [], []>} : vector<8x128xf32>, vector<128x128xf32>, vector<8x128xf32> -> vector<8x128xf32>
    %243 = arith.addf %240, %242 : vector<8x128xf32>
    %c0_164 = arith.constant 0 : index
    %c0_165 = arith.constant 0 : index
    %244 = vector.load %arg9[%c0_164, %c0_165] : memref<128x128xf32, #tpu.memory_space<vmem>>, vector<128x128xf32>
    %cst_166 = arith.constant dense<0.000000e+00> : vector<8x128xf32>
    %245 = tpu.matmul %237, %244, %cst_166 {dimension_numbers = #tpu.dot_dimension_numbers<[1], [0], [0], [1], [0, 0, 1, 1], [], []>} : vector<8x128xf32>, vector<128x128xf32>, vector<8x128xf32> -> vector<8x128xf32>
    %246 = arith.addf %243, %245 : vector<8x128xf32>
    %247 = math.tanh %246 : vector<8x128xf32>
    %248 = vector.shape_cast %247 : vector<8x128xf32> to vector<1x8x128xf32>
    %249 = arith.index_cast %c5_i32 : i32 to index
    %c0_167 = arith.constant 0 : index
    %c0_168 = arith.constant 0 : index
    %250 = vector.load %arg12[%249, %c0_167, %c0_168] : memref<8x8x128xf32, #tpu.memory_space<vmem>>, vector<1x8x128xf32>
    tpu.vector_store %arg12[%249, %c0_167, %c0_168], %248 {strides = array<i32>} : memref<8x8x128xf32, #tpu.memory_space<vmem>>, vector<1x8x128xf32>,
    %c6_i32 = arith.constant 6 : i32
    %251 = arith.index_cast %c6_i32 : i32 to index
    %c0_169 = arith.constant 0 : index
    %c0_170 = arith.constant 0 : index
    %252 = vector.load %arg1[%251, %c0_169, %c0_170] : memref<8x8x128xf32, #tpu.memory_space<vmem>>, vector<1x8x128xf32>
    %253 = vector.shape_cast %252 : vector<1x8x128xf32> to vector<8x128xf32>
    %c0_171 = arith.constant 0 : index
    %c0_172 = arith.constant 0 : index
    %254 = vector.load %arg4[%c0_171, %c0_172] : memref<1x128xf32, #tpu.memory_space<vmem>>, vector<1x128xf32>
    %255 = vector.broadcast %254 : vector<1x128xf32> to vector<8x128xf32>
    %256 = arith.mulf %253, %255 : vector<8x128xf32>
    %cst_173 = arith.constant dense<0.000000e+00> : vector<8xf32>
    %257 = vector.multi_reduction <add>, %256, %cst_173 [1] : vector<8x128xf32> to vector<8xf32>
    %258 = vector.shape_cast %257 : vector<8xf32> to vector<8x1xf32>
    %c0_174 = arith.constant 0 : index
    %c0_175 = arith.constant 0 : index
    %259 = vector.load %arg5[%c0_174, %c0_175] : memref<1x128xf32, #tpu.memory_space<vmem>>, vector<1x128xf32>
    %260 = vector.broadcast %259 : vector<1x128xf32> to vector<8x128xf32>
    %261 = arith.mulf %247, %260 : vector<8x128xf32>
    %cst_176 = arith.constant dense<0.000000e+00> : vector<8xf32>
    %262 = vector.multi_reduction <add>, %261, %cst_176 [1] : vector<8x128xf32> to vector<8xf32>
    %263 = vector.shape_cast %262 : vector<8xf32> to vector<8x1xf32>
    %264 = arith.addf %258, %263 : vector<8x1xf32>
    %c0_177 = arith.constant 0 : index
    %c0_178 = arith.constant 0 : index
    %265 = vector.load %arg6[%c0_177, %c0_178] : memref<1x128xf32, #tpu.memory_space<vmem>>, vector<1x128xf32>
    %266 = vector.broadcast %265 : vector<1x128xf32> to vector<8x128xf32>
    %267 = arith.mulf %237, %266 : vector<8x128xf32>
    %cst_179 = arith.constant dense<0.000000e+00> : vector<8xf32>
    %268 = vector.multi_reduction <add>, %267, %cst_179 [1] : vector<8x128xf32> to vector<8xf32>
    %269 = vector.shape_cast %268 : vector<8xf32> to vector<8x1xf32>
    %270 = arith.addf %264, %269 : vector<8x1xf32>
    %c0_180 = arith.constant 0 : index
    %c0_181 = arith.constant 0 : index
    %271 = vector.load %arg10[%c0_180, %c0_181] : memref<128x128xf32, #tpu.memory_space<vmem>>, vector<128x128xf32>
    %cst_182 = arith.constant dense<0.000000e+00> : vector<8x128xf32>
    %272 = tpu.matmul %237, %271, %cst_182 {dimension_numbers = #tpu.dot_dimension_numbers<[1], [0], [0], [1], [0, 0, 1, 1], [], []>} : vector<8x128xf32>, vector<128x128xf32>, vector<8x128xf32> -> vector<8x128xf32>
    %c0_183 = arith.constant 0 : index
    %c0_184 = arith.constant 0 : index
    %273 = vector.load %arg11[%c0_183, %c0_184] : memref<1x128xf32, #tpu.memory_space<vmem>>, vector<1x128xf32>
    %274 = vector.broadcast %270 : vector<8x1xf32> to vector<8x128xf32>
    %275 = vector.broadcast %273 : vector<1x128xf32> to vector<8x128xf32>
    %276 = arith.mulf %274, %275 : vector<8x128xf32>
    %277 = arith.addf %272, %276 : vector<8x128xf32>
    %278 = arith.index_cast %c6_i32 : i32 to index
    %c0_185 = arith.constant 0 : index
    %c0_186 = arith.constant 0 : index
    %279 = vector.load %arg12[%278, %c0_185, %c0_186] : memref<8x8x128xf32, #tpu.memory_space<vmem>>, vector<1x8x128xf32>
    %280 = vector.shape_cast %279 : vector<1x8x128xf32> to vector<8x128xf32>
    %c0_187 = arith.constant 0 : index
    %c0_188 = arith.constant 0 : index
    %281 = vector.load %arg8[%c0_187, %c0_188] : memref<128x128xf32, #tpu.memory_space<vmem>>, vector<128x128xf32>
    %cst_189 = arith.constant dense<0.000000e+00> : vector<8x128xf32>
    %282 = tpu.matmul %247, %281, %cst_189 {dimension_numbers = #tpu.dot_dimension_numbers<[1], [0], [0], [1], [0, 0, 1, 1], [], []>} : vector<8x128xf32>, vector<128x128xf32>, vector<8x128xf32> -> vector<8x128xf32>
    %283 = arith.addf %280, %282 : vector<8x128xf32>
    %c0_190 = arith.constant 0 : index
    %c0_191 = arith.constant 0 : index
    %284 = vector.load %arg9[%c0_190, %c0_191] : memref<128x128xf32, #tpu.memory_space<vmem>>, vector<128x128xf32>
    %cst_192 = arith.constant dense<0.000000e+00> : vector<8x128xf32>
    %285 = tpu.matmul %277, %284, %cst_192 {dimension_numbers = #tpu.dot_dimension_numbers<[1], [0], [0], [1], [0, 0, 1, 1], [], []>} : vector<8x128xf32>, vector<128x128xf32>, vector<8x128xf32> -> vector<8x128xf32>
    %286 = arith.addf %283, %285 : vector<8x128xf32>
    %287 = math.tanh %286 : vector<8x128xf32>
    %288 = vector.shape_cast %287 : vector<8x128xf32> to vector<1x8x128xf32>
    %289 = arith.index_cast %c6_i32 : i32 to index
    %c0_193 = arith.constant 0 : index
    %c0_194 = arith.constant 0 : index
    %290 = vector.load %arg12[%289, %c0_193, %c0_194] : memref<8x8x128xf32, #tpu.memory_space<vmem>>, vector<1x8x128xf32>
    tpu.vector_store %arg12[%289, %c0_193, %c0_194], %288 {strides = array<i32>} : memref<8x8x128xf32, #tpu.memory_space<vmem>>, vector<1x8x128xf32>,
    %c7_i32 = arith.constant 7 : i32
    %291 = arith.index_cast %c7_i32 : i32 to index
    %c0_195 = arith.constant 0 : index
    %c0_196 = arith.constant 0 : index
    %292 = vector.load %arg1[%291, %c0_195, %c0_196] : memref<8x8x128xf32, #tpu.memory_space<vmem>>, vector<1x8x128xf32>
    %293 = vector.shape_cast %292 : vector<1x8x128xf32> to vector<8x128xf32>
    %c0_197 = arith.constant 0 : index
    %c0_198 = arith.constant 0 : index
    %294 = vector.load %arg4[%c0_197, %c0_198] : memref<1x128xf32, #tpu.memory_space<vmem>>, vector<1x128xf32>
    %295 = vector.broadcast %294 : vector<1x128xf32> to vector<8x128xf32>
    %296 = arith.mulf %293, %295 : vector<8x128xf32>
    %cst_199 = arith.constant dense<0.000000e+00> : vector<8xf32>
    %297 = vector.multi_reduction <add>, %296, %cst_199 [1] : vector<8x128xf32> to vector<8xf32>
    %298 = vector.shape_cast %297 : vector<8xf32> to vector<8x1xf32>
    %c0_200 = arith.constant 0 : index
    %c0_201 = arith.constant 0 : index
    %299 = vector.load %arg5[%c0_200, %c0_201] : memref<1x128xf32, #tpu.memory_space<vmem>>, vector<1x128xf32>
    %300 = vector.broadcast %299 : vector<1x128xf32> to vector<8x128xf32>
    %301 = arith.mulf %287, %300 : vector<8x128xf32>
    %cst_202 = arith.constant dense<0.000000e+00> : vector<8xf32>
    %302 = vector.multi_reduction <add>, %301, %cst_202 [1] : vector<8x128xf32> to vector<8xf32>
    %303 = vector.shape_cast %302 : vector<8xf32> to vector<8x1xf32>
    %304 = arith.addf %298, %303 : vector<8x1xf32>
    %c0_203 = arith.constant 0 : index
    %c0_204 = arith.constant 0 : index
    %305 = vector.load %arg6[%c0_203, %c0_204] : memref<1x128xf32, #tpu.memory_space<vmem>>, vector<1x128xf32>
    %306 = vector.broadcast %305 : vector<1x128xf32> to vector<8x128xf32>
    %307 = arith.mulf %277, %306 : vector<8x128xf32>
    %cst_205 = arith.constant dense<0.000000e+00> : vector<8xf32>
    %308 = vector.multi_reduction <add>, %307, %cst_205 [1] : vector<8x128xf32> to vector<8xf32>
    %309 = vector.shape_cast %308 : vector<8xf32> to vector<8x1xf32>
    %310 = arith.addf %304, %309 : vector<8x1xf32>
    %c0_206 = arith.constant 0 : index
    %c0_207 = arith.constant 0 : index
    %311 = vector.load %arg10[%c0_206, %c0_207] : memref<128x128xf32, #tpu.memory_space<vmem>>, vector<128x128xf32>
    %cst_208 = arith.constant dense<0.000000e+00> : vector<8x128xf32>
    %312 = tpu.matmul %277, %311, %cst_208 {dimension_numbers = #tpu.dot_dimension_numbers<[1], [0], [0], [1], [0, 0, 1, 1], [], []>} : vector<8x128xf32>, vector<128x128xf32>, vector<8x128xf32> -> vector<8x128xf32>
    %c0_209 = arith.constant 0 : index
    %c0_210 = arith.constant 0 : index
    %313 = vector.load %arg11[%c0_209, %c0_210] : memref<1x128xf32, #tpu.memory_space<vmem>>, vector<1x128xf32>
    %314 = vector.broadcast %310 : vector<8x1xf32> to vector<8x128xf32>
    %315 = vector.broadcast %313 : vector<1x128xf32> to vector<8x128xf32>
    %316 = arith.mulf %314, %315 : vector<8x128xf32>
    %317 = arith.addf %312, %316 : vector<8x128xf32>
    %318 = arith.index_cast %c7_i32 : i32 to index
    %c0_211 = arith.constant 0 : index
    %c0_212 = arith.constant 0 : index
    %319 = vector.load %arg12[%318, %c0_211, %c0_212] : memref<8x8x128xf32, #tpu.memory_space<vmem>>, vector<1x8x128xf32>
    %320 = vector.shape_cast %319 : vector<1x8x128xf32> to vector<8x128xf32>
    %c0_213 = arith.constant 0 : index
    %c0_214 = arith.constant 0 : index
    %321 = vector.load %arg8[%c0_213, %c0_214] : memref<128x128xf32, #tpu.memory_space<vmem>>, vector<128x128xf32>
    %cst_215 = arith.constant dense<0.000000e+00> : vector<8x128xf32>
    %322 = tpu.matmul %287, %321, %cst_215 {dimension_numbers = #tpu.dot_dimension_numbers<[1], [0], [0], [1], [0, 0, 1, 1], [], []>} : vector<8x128xf32>, vector<128x128xf32>, vector<8x128xf32> -> vector<8x128xf32>
    %323 = arith.addf %320, %322 : vector<8x128xf32>
    %c0_216 = arith.constant 0 : index
    %c0_217 = arith.constant 0 : index
    %324 = vector.load %arg9[%c0_216, %c0_217] : memref<128x128xf32, #tpu.memory_space<vmem>>, vector<128x128xf32>
    %cst_218 = arith.constant dense<0.000000e+00> : vector<8x128xf32>
    %325 = tpu.matmul %317, %324, %cst_218 {dimension_numbers = #tpu.dot_dimension_numbers<[1], [0], [0], [1], [0, 0, 1, 1], [], []>} : vector<8x128xf32>, vector<128x128xf32>, vector<8x128xf32> -> vector<8x128xf32>
    %326 = arith.addf %323, %325 : vector<8x128xf32>
    %327 = math.tanh %326 : vector<8x128xf32>
    %328 = vector.shape_cast %327 : vector<8x128xf32> to vector<1x8x128xf32>
    %329 = arith.index_cast %c7_i32 : i32 to index
    %c0_219 = arith.constant 0 : index
    %c0_220 = arith.constant 0 : index
    %330 = vector.load %arg12[%329, %c0_219, %c0_220] : memref<8x8x128xf32, #tpu.memory_space<vmem>>, vector<1x8x128xf32>
    tpu.vector_store %arg12[%329, %c0_219, %c0_220], %328 {strides = array<i32>} : memref<8x8x128xf32, #tpu.memory_space<vmem>>, vector<1x8x128xf32>,
    %c8_i32 = arith.constant 8 : i32
    %c0_221 = arith.constant 0 : index
    %c0_222 = arith.constant 0 : index
    %331 = vector.load %arg15[%c0_221, %c0_222] : memref<8x128xf32, #tpu.memory_space<vmem>>, vector<8x128xf32>
    tpu.vector_store %arg15[%c0_221, %c0_222], %327 {strides = array<i32>} : memref<8x128xf32, #tpu.memory_space<vmem>>, vector<8x128xf32>,
    %c0_223 = arith.constant 0 : index
    %c0_224 = arith.constant 0 : index
    %332 = vector.load %arg16[%c0_223, %c0_224] : memref<8x128xf32, #tpu.memory_space<vmem>>, vector<8x128xf32>
    tpu.vector_store %arg16[%c0_223, %c0_224], %317 {strides = array<i32>} : memref<8x128xf32, #tpu.memory_space<vmem>>, vector<8x128xf32>,
    %c0_225 = arith.constant 0 : index
    %c0_226 = arith.constant 0 : index
    %333 = vector.load %arg13[%c0_225, %c0_226] : memref<8x128xf32, #tpu.memory_space<vmem>>, vector<8x128xf32>
    tpu.vector_store %arg13[%c0_225, %c0_226], %327 {strides = array<i32>} : memref<8x128xf32, #tpu.memory_space<vmem>>, vector<8x128xf32>,
    %c0_227 = arith.constant 0 : index
    %c0_228 = arith.constant 0 : index
    %334 = vector.load %arg14[%c0_227, %c0_228] : memref<8x128xf32, #tpu.memory_space<vmem>>, vector<8x128xf32>
    tpu.vector_store %arg14[%c0_227, %c0_228], %317 {strides = array<i32>} : memref<8x128xf32, #tpu.memory_space<vmem>>, vector<8x128xf32>,
    return
  }
  func.func @transform_0(%arg0: i32) -> (i32, i32, i32) {
    %c0_i32 = arith.constant 0 : i32
    %c0_i32_0 = arith.constant 0 : i32
    %c0_i32_1 = arith.constant 0 : i32
    return %arg0, %c0_i32, %c0_i32_0 : i32, i32, i32
  }
  func.func @transform_1(%arg0: i32) -> (i32, i32) {
    %c0_i32 = arith.constant 0 : i32
    %c0_i32_0 = arith.constant 0 : i32
    %c0_i32_1 = arith.constant 0 : i32
    return %c0_i32, %c0_i32_0 : i32, i32
  }
  func.func @transform_2(%arg0: i32) -> (i32, i32) {
    %c0_i32 = arith.constant 0 : i32
    %c0_i32_0 = arith.constant 0 : i32
    %c0_i32_1 = arith.constant 0 : i32
    return %c0_i32, %c0_i32_0 : i32, i32
  }
  func.func @transform_3(%arg0: i32) -> (i32, i32) {
    %c0_i32 = arith.constant 0 : i32
    %c0_i32_0 = arith.constant 0 : i32
    %c0_i32_1 = arith.constant 0 : i32
    return %c0_i32, %c0_i32_0 : i32, i32
  }
  func.func @transform_4(%arg0: i32) -> (i32, i32) {
    %c0_i32 = arith.constant 0 : i32
    %c0_i32_0 = arith.constant 0 : i32
    %c0_i32_1 = arith.constant 0 : i32
    return %c0_i32, %c0_i32_0 : i32, i32
  }
  func.func @transform_5(%arg0: i32) -> (i32, i32) {
    %c0_i32 = arith.constant 0 : i32
    %c0_i32_0 = arith.constant 0 : i32
    %c0_i32_1 = arith.constant 0 : i32
    return %c0_i32, %c0_i32_0 : i32, i32
  }
  func.func @transform_6(%arg0: i32) -> (i32, i32) {
    %c0_i32 = arith.constant 0 : i32
    %c0_i32_0 = arith.constant 0 : i32
    %c0_i32_1 = arith.constant 0 : i32
    return %c0_i32, %c0_i32_0 : i32, i32
  }
  func.func @transform_7(%arg0: i32) -> (i32, i32) {
    %c0_i32 = arith.constant 0 : i32
    %c0_i32_0 = arith.constant 0 : i32
    %c0_i32_1 = arith.constant 0 : i32
    return %c0_i32, %c0_i32_0 : i32, i32
  }
  func.func @transform_8(%arg0: i32) -> (i32, i32) {
    %c0_i32 = arith.constant 0 : i32
    %c0_i32_0 = arith.constant 0 : i32
    %c0_i32_1 = arith.constant 0 : i32
    return %c0_i32, %c0_i32_0 : i32, i32
  }
  func.func @transform_9(%arg0: i32) -> (i32, i32) {
    %c0_i32 = arith.constant 0 : i32
    %c0_i32_0 = arith.constant 0 : i32
    %c0_i32_1 = arith.constant 0 : i32
    return %c0_i32, %c0_i32_0 : i32, i32
  }
  func.func @transform_10(%arg0: i32) -> (i32, i32) {
    %c0_i32 = arith.constant 0 : i32
    %c0_i32_0 = arith.constant 0 : i32
    %c0_i32_1 = arith.constant 0 : i32
    return %c0_i32, %c0_i32_0 : i32, i32
  }
  func.func @transform_11(%arg0: i32) -> (i32, i32, i32) {
    %c0_i32 = arith.constant 0 : i32
    %c0_i32_0 = arith.constant 0 : i32
    %c0_i32_1 = arith.constant 0 : i32
    return %arg0, %c0_i32, %c0_i32_0 : i32, i32, i32
  }
  func.func @transform_12(%arg0: i32) -> (i32, i32) {
    %c0_i32 = arith.constant 0 : i32
    %c0_i32_0 = arith.constant 0 : i32
    %c0_i32_1 = arith.constant 0 : i32
    return %c0_i32, %c0_i32_0 : i32, i32
  }
  func.func @transform_13(%arg0: i32) -> (i32, i32) {
    %c0_i32 = arith.constant 0 : i32
    %c0_i32_0 = arith.constant 0 : i32
    %c0_i32_1 = arith.constant 0 : i32
    return %c0_i32, %c0_i32_0 : i32, i32
  }
}

</mosaic_0001>

<bundles_post_ra>
// kernel: tpu_custom_call.1
= control target key start
LH: loop header
LB: loop body
LE: loop exit
PB: predicated region body
PF: predicated region fallthrough
CT: control target
= control target key end

     0   :  { %s6949_s0 = inlined_call_operand.hbm [shape: f32[16,8,128], index: 0, kind: input, shape index: {}]   ;;  %s6950_s1 = inlined_call_operand.hbm [shape: f32[8,128], index: 1, kind: input, shape index: {}]   ;;  %s6951_s2 = inlined_call_operand.hbm [shape: f32[8,128], index: 2, kind: input, shape index: {}]   ;;  %s6952_s3 = inlined_call_operand.vmem [shape: f32[1,128], index: 3, kind: input, shape index: {}]   ;;  %s6953_s4 = inlined_call_operand.vmem [shape: f32[1,128], index: 4, kind: input, shape index: {}]   ;;  %s6954_s5 = inlined_call_operand.vmem [shape: f32[1,128], index: 5, kind: input, shape index: {}]   ;;  %s6955_s6 = inlined_call_operand.hbm [shape: f32[128,128], index: 6, kind: input, shape index: {}]   ;;  %s6956_s7 = inlined_call_operand.hbm [shape: f32[128,128], index: 7, kind: input, shape index: {}]   ;;  %s6957_s8 = inlined_call_operand.hbm [shape: f32[128,128], index: 8, kind: input, shape index: {}]   ;;  %s6958_s9 = inlined_call_operand.hbm [shape: f32[128,128], index: 9, kind: input, shape index: {}]   ;;  %s6959_s10 = inlined_call_operand.vmem [shape: f32[1,128], index: 10, kind: input, shape index: {}]   ;;  %s6960_s11 = inlined_call_operand.hbm [shape: f32[16,8,128], index: 11, kind: output, shape index: {0}]   ;;  %s6961_s12 = inlined_call_operand.hbm [shape: f32[8,128], index: 12, kind: output, shape index: {1}]   ;;  %s6962_s13 = inlined_call_operand.hbm [shape: f32[8,128], index: 13, kind: output, shape index: {2}]  }
   0x1   :  { %6972 = sst [smem:[#allocation26_spill]] %s6949_s0 }
   0x2   :  { %6973 = sst [smem:[#allocation27_spill]] %s6950_s1 }
   0x3   :  { %6974 = sst [smem:[#allocation28_spill]] %s6951_s2 }
   0x4   :  { %6975 = sst [smem:[#allocation29_spill]] %s6952_s3 }
   0x5   :  { %6976 = sst [smem:[#allocation30_spill]] %s6955_s6 }
   0x6   :  { %6977 = sst [smem:[#allocation31_spill]] %s6959_s10 }
   0x7   :  { %6978 = sst [smem:[#allocation32_spill]] %s6960_s11 }
   0x8   :  { %6979 = sst [smem:[#allocation33_spill]] %s6961_s12 }
   0x9   :  { %6980 = sst [smem:[#allocation34_spill]] %s6962_s13 }
   0xa   :  { %19 = vsyncpa [#allocation5], 0 }
   0xb   :  { %21 = vsyncpa [#allocation5 + $0x1], 0 }
   0xc   :  { %22 = vsyncpa [#allocation8], 0 }
   0xd   :  { %23 = vsyncpa [#allocation11], 0 }
   0xe   :  { %24 = vsyncpa [#allocation14], 0 }
   0xf   :  { %25 = vsyncpa [#allocation6], 0 }
  0x10   :  { %27 = vsyncpa [#allocation6 + $0x1], 0 }
  0x11   :  { %28 = vsyncpa [#allocation18], 0  ;;  %s5899_s25 = smov 0   ;;  %s5901_s26 = smov 0  }
  0x12   :  { %s5903_s27 = smov 0   ;;  %s5905_s28 = smov 0  }
  0x13 LB: > { %s5812_s29 = smov [#allocation7]   ;;  %s5920_s14 = sadd.s32 4294967295, %s5810_s28   ;;  %s5810_s28 = sphi %s5905_s28, %s7022_s28   ;;  %s5806_s27 = sphi %s5903_s27, %s7021_s27   ;;  %s5802_s26 = sphi %s5901_s26, %s7020_s26   ;;  %s5798_s25 = sphi %s5899_s25, %s7019_s25  }
  0x14   : > { %s356_s30 = sshll.u32 %s5812_s29, 4  ;;  %p3325_p0 = scmp.ge.s32.totalorder %s5810_s28, 1  ;;  %s357_s30 = int_to_ptr.vmem [resolvable:$true] %s356_s30 }
  0x15   : > { %p6964_p1 = scmp.eq.s32.totalorder %s5920_s14, 0  ;;  %p343_p2 = scmp.lt.s32.totalorder %s5810_s28, 3 }
  0x16   : > { %s5813_s16 = smov [#allocation10]   ;;  %s5814_s19 = smov [#allocation13]  }
  0x17   : > { %p5926_p4 = pnand %p3325_p0, %p343_p2  ;;  %s386_s17 = sshll.u32 %s5813_s16, 4  ;;  %s5933_s17 = int_to_ptr.vmem [resolvable:$true] %s386_s17 }
  0x18   : > { %s412_s20 = sshll.u32 %s5814_s19, 4  ;;  %s6983_s1 = sld [smem:[#allocation27_spill]]  ;;  %s5941_s20 = int_to_ptr.vmem [resolvable:$true] %s412_s20 }
  0x19   : > { %s6981_s15 = scalar_select %p5926_p4, 1, 0 }
  0x1a   : > { %p5370_p6 = pneg %p5926_p4 }
  0x1c   : > { %p5937_p7 = pnand %p5370_p6, %p6964_p1 }
  0x1e   : > { %s5478_s23 = scalar_lea.hbm %s6983_s1, 128  ;;  %p5951_p9 = pneg %p5937_p7 }
  0x1f   : > { %p5479_p8 = scmp.ne.s32.totalorder %s6983_s1, %s5478_s23  ;;  %p5485_p12 = scmp.lt.u32.totalorder %s5478_s23, %s6983_s1 }
  0x21   : > { %p5481_p10 = pnand %p5951_p9, %p5479_p8 }
  0x23   : > { %p5482_p11 = pneg %p5481_p10 }
  0x25   : > { %p5487_p13 = pnand %p5485_p12, %p5482_p11 }
  0x27   : > { %5490 = shalt.err (!%p5487_p13)
}
  0x28   : > { %s5491_s21 = scalar_lea.vmem %s357_s30, 128  ;;  %p5499_p5 = scmp.lt.s32.totalorder %s357_s30, %s357_s30 }
  0x29   : > { %p5492_p0 = scmp.ne.s32.totalorder %s357_s30, %s5491_s21  ;;  %p5500_p3 = scmp.lt.s32.totalorder %s5491_s21, %s5491_s21 }
  0x2b   : > { %p5494_p2 = pnand %p5492_p0, %p5951_p9  ;;  %p5501_p1 = por %p5500_p3, %p5499_p5 }
  0x2d   : > { %p5495_p6 = pneg %p5494_p2 }
  0x2f   : > { %p5502_p4 = pnand %p5501_p1, %p5495_p6 }
  0x31   : > { %5505 = shalt.err (!%p5502_p4)
}
  0x32   : > { %5373 = dma.hbm_to_vmem [thread:$0]  (!%p5937_p7), %s6983_s1, 128, %s357_s30, [#allocation8]  }
  0x33   : > { %s6985_s6 = sld [smem:[#allocation30_spill]] }
  0x39   : > { %s5506_s29 = scalar_lea.hbm %s6985_s6, 2048 }
  0x3a   : > { %p5507_p8 = scmp.ne.s32.totalorder %s6985_s6, %s5506_s29  ;;  %p5513_p1 = scmp.lt.u32.totalorder %s5506_s29, %s6985_s6 }
  0x3c   : > { %p5509_p10 = pnand %p5507_p8, %p5951_p9 }
  0x3e   : > { %p5510_p3 = pneg %p5509_p10 }
  0x40   : > { %p5515_p4 = pnand %p5513_p1, %p5510_p3 }
  0x42   : > { %5518 = shalt.err (!%p5515_p4)
}
  0x43   : > { %s5519_s30 = scalar_lea.vmem %s5933_s17, 2048  ;;  %p5527_p13 = scmp.lt.s32.totalorder %s5933_s17, %s5933_s17 }
  0x44   : > { %p5520_p5 = scmp.ne.s32.totalorder %s5933_s17, %s5519_s30  ;;  %p5528_p0 = scmp.lt.s32.totalorder %s5519_s30, %s5519_s30 }
  0x46   : > { %p5522_p11 = pnand %p5520_p5, %p5951_p9  ;;  %p5529_p2 = por %p5528_p0, %p5527_p13 }
  0x48   : > { %p5523_p12 = pneg %p5522_p11 }
  0x4a   : > { %p5530_p6 = pnand %p5529_p2, %p5523_p12 }
  0x4c   : > { %5533 = shalt.err (!%p5530_p6)
}
  0x4d   : > { %s6969_s12 = smov 128   ;;  %s5816_s11 = smov 8  }
  0x4e   : > { %5379 = dma.hbm_to_vmem [thread:$0]  (!%p5937_p7), %s6985_s6, 2048, %s5933_s17, [#allocation11], %s6969_s12, %s6969_s12, %s5816_s11  }
  0x4f   : > { %s5534_s29 = scalar_lea.hbm %s6957_s8, 2048 }
  0x50   : > { %p5535_p8 = scmp.ne.s32.totalorder %s6957_s8, %s5534_s29  ;;  %p5541_p1 = scmp.lt.u32.totalorder %s5534_s29, %s6957_s8 }
  0x52   : > { %p5537_p10 = pnand %p5535_p8, %p5951_p9 }
  0x54   : > { %p5538_p3 = pneg %p5537_p10 }
  0x56   : > { %p5543_p4 = pnand %p5541_p1, %p5538_p3 }
  0x58   : > { %5546 = shalt.err (!%p5543_p4)
}
  0x59   : > { %s5547_s17 = scalar_lea.vmem %s5941_s20, 2048  ;;  %p5555_p13 = scmp.lt.s32.totalorder %s5941_s20, %s5941_s20 }
  0x5a   : > { %p5548_p5 = scmp.ne.s32.totalorder %s5941_s20, %s5547_s17  ;;  %p5556_p0 = scmp.lt.s32.totalorder %s5547_s17, %s5547_s17 }
  0x5c   : > { %p5550_p11 = pnand %p5548_p5, %p5951_p9  ;;  %p5557_p2 = por %p5556_p0, %p5555_p13 }
  0x5e   : > { %p5551_p12 = pneg %p5550_p11 }
  0x60   : > { %p5558_p6 = pnand %p5557_p2, %p5551_p12 }
  0x62   : > { %5561 = shalt.err (!%p5558_p6)
}
  0x63   : > { %5385 = dma.hbm_to_vmem [thread:$0]  (!%p5937_p7), %s6957_s8, 2048, %s5941_s20, [#allocation14], %s6969_s12, %s6969_s12, %s5816_s11  }
  0x64   : > { %s5817_s24 = smov [#allocation9]   ;;  %s5818_s23 = smov [#allocation12]  }
  0x65   : > { %s367_s13 = sshll.u32 %s5817_s24, 4  ;;  %s399_s29 = sshll.u32 %s5818_s23, 4  ;;  %s368_s13 = int_to_ptr.vmem [resolvable:$true] %s367_s13  ;;  %s400_s29 = int_to_ptr.vmem [resolvable:$true] %s399_s29 }
  0x66   : > { %s6986_s2 = sld [smem:[#allocation28_spill]] }
  0x6c   : > { %s5562_s30 = scalar_lea.hbm %s6986_s2, 128 }
  0x6d   : > { %p5563_p8 = scmp.ne.s32.totalorder %s6986_s2, %s5562_s30  ;;  %p5569_p1 = scmp.lt.u32.totalorder %s5562_s30, %s6986_s2 }
  0x6f   : > { %p5565_p10 = pnand %p5563_p8, %p5951_p9 }
  0x71   : > { %p5566_p3 = pneg %p5565_p10 }
  0x73   : > { %p5571_p4 = pnand %p5569_p1, %p5566_p3 }
  0x75   : > { %5574 = shalt.err (!%p5571_p4)
}
  0x76   : > { %s5575_s20 = scalar_lea.vmem %s368_s13, 128  ;;  %p5583_p13 = scmp.lt.s32.totalorder %s368_s13, %s368_s13 }
  0x77   : > { %p5576_p5 = scmp.ne.s32.totalorder %s368_s13, %s5575_s20  ;;  %p5584_p0 = scmp.lt.s32.totalorder %s5575_s20, %s5575_s20 }
  0x79   : > { %p5578_p11 = pnand %p5576_p5, %p5951_p9  ;;  %p5585_p2 = por %p5584_p0, %p5583_p13 }
  0x7b   : > { %p5579_p12 = pneg %p5578_p11 }
  0x7d   : > { %p5586_p6 = pnand %p5585_p2, %p5579_p12 }
  0x7f   : > { %5589 = shalt.err (!%p5586_p6)
}
  0x80   : > { %5376 = dma.hbm_to_vmem [thread:$0]  (!%p5937_p7), %s6986_s2, 128, %s368_s13, [#allocation8]  }
  0x81   : > { %s5590_s23 = scalar_lea.hbm %s6956_s7, 2048 }
  0x82   : > { %p5591_p8 = scmp.ne.s32.totalorder %s6956_s7, %s5590_s23  ;;  %p5597_p1 = scmp.lt.u32.totalorder %s5590_s23, %s6956_s7 }
  0x84   : > { %p5593_p10 = pnand %p5591_p8, %p5951_p9 }
  0x86   : > { %p5594_p3 = pneg %p5593_p10 }
  0x88   : > { %p5599_p4 = pnand %p5597_p1, %p5594_p3 }
  0x8a   : > { %5602 = shalt.err (!%p5599_p4)
}
  0x8b   : > { %s5603_s1 = scalar_lea.vmem %s400_s29, 2048  ;;  %p5611_p13 = scmp.lt.s32.totalorder %s400_s29, %s400_s29 }
  0x8c   : > { %p5604_p5 = scmp.ne.s32.totalorder %s400_s29, %s5603_s1  ;;  %p5612_p0 = scmp.lt.s32.totalorder %s5603_s1, %s5603_s1 }
  0x8e   : > { %p5606_p11 = pnand %p5604_p5, %p5951_p9  ;;  %p5613_p2 = por %p5612_p0, %p5611_p13 }
  0x90   : > { %p5607_p12 = pneg %p5606_p11 }
  0x92   : > { %p5614_p6 = pnand %p5613_p2, %p5607_p12 }
  0x94   : > { %5617 = shalt.err (!%p5614_p6)
}
  0x95   : > { %5382 = dma.hbm_to_vmem [thread:$0]  (!%p5937_p7), %s6956_s7, 2048, %s400_s29, [#allocation11], %s6969_s12, %s6969_s12, %s5816_s11  }
  0x96   : > { %s5819_s6 = smov [#allocation15]   ;;  %s5618_s23 = scalar_lea.hbm %s6958_s9, 2048 }
  0x97   : > { %s425_s22 = sshll.u32 %s5819_s6, 4  ;;  %p5619_p8 = scmp.ne.s32.totalorder %s6958_s9, %s5618_s23  ;;  %s426_s22 = int_to_ptr.vmem [resolvable:$true] %s425_s22 }
  0x98   : > { %p5625_p1 = scmp.lt.u32.totalorder %s5618_s23, %s6958_s9 }
  0x99   : > { %p5621_p10 = pnand %p5619_p8, %p5951_p9 }
  0x9b   : > { %p5622_p3 = pneg %p5621_p10 }
  0x9d   : > { %p5627_p4 = pnand %p5625_p1, %p5622_p3 }
  0x9f   : > { %5630 = shalt.err (!%p5627_p4)
}
  0xa0   : > { %s5631_s29 = scalar_lea.vmem %s426_s22, 2048  ;;  %p5639_p13 = scmp.lt.s32.totalorder %s426_s22, %s426_s22 }
  0xa1   : > { %p5632_p5 = scmp.ne.s32.totalorder %s426_s22, %s5631_s29  ;;  %p5640_p0 = scmp.lt.s32.totalorder %s5631_s29, %s5631_s29 }
  0xa3   : > { %p5634_p11 = pnand %p5632_p5, %p5951_p9  ;;  %p5641_p2 = por %p5640_p0, %p5639_p13 }
  0xa5   : > { %p5635_p12 = pneg %p5634_p11 }
  0xa7   : > { %p5642_p6 = pnand %p5641_p2, %p5635_p12 }
  0xa9   : > { %5645 = shalt.err (!%p5642_p6)
}
  0xaa   : > { %5388 = dma.hbm_to_vmem [thread:$0]  (!%p5937_p7), %s6958_s9, 2048, %s426_s22, [#allocation14], %s6969_s12, %s6969_s12, %s5816_s11  }
  0xab   : > { %s3324_s18 = sadd.s32 4294967294, %s5810_s28   ;;  %s6081_s16 = sadd.s32 1, %s5810_s28  }
  0xac   : > { %s38_s20 = ssub.s32 %s5810_s28, %s6081_s16  ;;  %s41_s6 = sadd.s32 1, %s5806_s27 }
  0xad   : > { %p39_p9 = scmp.eq.s32.totalorder %s38_s20, 0  ;;  %p48_p8 = scmp.ne.s32.totalorder %s5806_s27, %s5802_s26 }
  0xae   : > { %p49_p10 = scmp.eq.s32.totalorder %s5810_s28, 0  ;;  %p54_p3 = scmp.ne.s32.totalorder %s5802_s26, %s5798_s25 }
  0xaf   : > { %s6092_s10 = scalar_select %p39_p9, %s5806_s27, %s41_s6  }
  0xb0   : > { %p6094_p1 = por %p49_p10, %p48_p8  ;;  %p6988_p4 = scmp.eq.s32.totalorder %s5920_s14, 0 }
  0xb1   : > { %p6970_p5 = scmp.eq.s32.totalorder %s5920_s14, 1  ;;  %p294_p11 = scmp.eq.s32.totalorder %s3324_s18, 1 }
  0xb2   : > { %p6100_p7 = por %p6988_p4, %p54_p3  ;;  %p5403_p12 = scmp.lt.s32.totalorder %s5810_s28, 2 }
  0xb3   : > { %s442_s23 = sand.u32 1, %s5806_s27   ;;  %p6109_p13 = por %p6970_p5, %p48_p8 }
  0xb4   : > { %p6113_p0 = por %p294_p11, %p54_p3  ;;  %s3333_s30 = sshll.u32 %s442_s23, 6 }
  0xb5   : > { %s6990_s19 = scalar_select %p6109_p13, 1, 0 }
  0xb6   : > { %s6991_s21 = scalar_select %p6113_p0, 1, 0 }
  0xb7   : > { %s3408_s17 = sshll.u32 %s5810_s28, 10  ;;  %s6992_s0 = sld [smem:[#allocation26_spill]] }
  0xb8   : > { %s446_s18 = scalar_lea.vmem [#allocation4], %s3333_s30  ;;  %p6127_p2 = pnand %p5403_p12, %p6094_p1 }
  0xb9   : > { %s453_s20 = sshll.u32 %s446_s18, 4  ;;  %s6131_s12 = scalar_lea.sflag [#allocation5], %s442_s23  ;;  %s6123_s20 = int_to_ptr.vmem [resolvable:$true] %s453_s20 }
  0xba   : > { %p5648_p9 = pneg %p6127_p2 }
  0xbd   : > { %s6121_s13 = scalar_lea.hbm %s6992_s0, %s3408_s17  ;;  %s5651_s24 = scalar_lea.hbm %s6992_s0, 2048 }
  0xbe   : > { %s5646_s29 = scalar_lea.hbm %s6121_s13, 1024  ;;  %p5652_p3 = scmp.lt.u32.totalorder %s6121_s13, %s6992_s0 }
  0xbf   : > { %p5647_p6 = scmp.ne.s32.totalorder %s6121_s13, %s5646_s29  ;;  %p5653_p1 = scmp.lt.u32.totalorder %s5651_s24, %s5646_s29 }
  0xc0   : > { %p5655_p11 = scmp.lt.u32.totalorder %s5646_s29, %s6121_s13 }
  0xc1   : > { %p5649_p8 = pnand %p5648_p9, %p5647_p6  ;;  %p5654_p4 = por %p5653_p1, %p5652_p3 }
  0xc3   : > { %p5650_p10 = pneg %p5649_p8  ;;  %p5656_p12 = por %p5655_p11, %p5654_p4 }
  0xc5   : > { %p5657_p5 = pnand %p5656_p12, %p5650_p10 }
  0xc7   : > { %5660 = shalt.err (!%p5657_p5)
}
  0xc8   : > { %s5661_s23 = scalar_lea.vmem %s6123_s20, 1024  ;;  %s5820_s30 = smov [#allocation4]  }
  0xc9   : > { %p5662_p6 = scmp.ne.s32.totalorder %s6123_s20, %s5661_s23  ;;  %s5666_s17 = sshll.u32 %s5820_s30, 4  ;;  %s5667_s17 = int_to_ptr.vmem [resolvable:$false] %s5666_s17 }
  0xca   : > { %s5668_s1 = scalar_lea.vmem %s5667_s17, 2048  ;;  %p5669_p13 = scmp.lt.s32.totalorder %s6123_s20, %s5667_s17 }
  0xcb   : > { %p5664_p8 = pnand %p5662_p6, %p5648_p9  ;;  %p5670_p3 = scmp.lt.s32.totalorder %s5668_s1, %s5661_s23 }
  0xcd   : > { %p5665_p0 = pneg %p5664_p8  ;;  %p5671_p1 = por %p5670_p3, %p5669_p13 }
  0xcf   : > { %p5672_p4 = pnand %p5671_p1, %p5665_p0 }
  0xd1   : > { %5675 = shalt.err (!%p5672_p4)
}
  0xd2   : > { %s6994_s29 = smov 128   ;;  %p6995_p5 = scmp.ne.s32.totalorder %s6981_s15, 0 }
  0xd3   : > { %5392 = dma.hbm_to_vmem [thread:$0]  (!%p6127_p2), %s6121_s13, 1024, %s6123_s20, %s6131_s12, %s6994_s29, %s6994_s29, %s5816_s11  }
  0xd4   : > { %465 = sbr.rel (%p6995_p5) target bundleno = 3429 (0xd65), region = 64  ;;  %s6165_s24 = sand.u32 (!%p6995_p5), 1, %s5802_s26  }
  0xd5   : > { %s3337_s18 = sshll.u32 (!%p6995_p5), %s6165_s24, 6  ;;  %s468_s23 = scalar_lea.sflag (!%p6995_p5), [#allocation5], %s6165_s24 }
  0xd6   : > { %s6169_s30 = scalar_lea.vmem (!%p6995_p5), [#allocation4], %s3337_s18 }
  0xdb   : > { %5773 = dma.done.wait (%p6100_p7), %s468_s23, 1024  }
  0xdc   : > { %5775 = vsyncadd (%p6100_p7), %s468_s23, 4294966272  ;;  %p6996_p13 = scmp.eq.s32.totalorder %s5920_s14, 0 }
  0xde   : > { %5777 = dma.done.wait (%p6996_p13), [#allocation8], 256   ;;  %p6997_p0 = pmov %p6996_p13 }
  0xe0   : > { %5779 = vsyncadd (%p6997_p0), [#allocation8], 4294967040  ;;  %p6998_p2 = pmov %p6997_p0 }
  0xe1   : > { %p6999_p9 = pmov %p6997_p0 }
  0xe2   : > { %5781 = dma.done.wait (%p6998_p2), [#allocation11], 4096  }
  0xe3   : > { %5783 = vsyncadd (%p6999_p9), [#allocation11], 4294963200  ;;  %p7000_p10 = pmov %p6997_p0 }
  0xe4   : > { %p7001_p11 = pmov %p6997_p0 }
  0xe5   : > { %5785 = dma.done.wait (%p7000_p10), [#allocation14], 4096  }
  0xe6   : > { %5787 = vsyncadd (%p7001_p11), [#allocation14], 4294963200  ;;  %s6187_s15 = scalar_lea.vmem [#allocation16], %s3337_s18  ;;  %p7002_p7 = scmp.ne.s32.totalorder %s5920_s14, 0 }
  0xe7   : > { %v544_v0 = vld [vmem:[#allocation7] sm:$0xff] (!%p7002_p7)  ;;  %v546_v1 = vld [vmem:[#allocation9] sm:$0xff] (!%p7002_p7) }
  0xe8   : > { %543 = sbr.rel (%p7002_p7) target bundleno = 239 (0xef), region = 96  ;;  %545 = vst [vmem:[#allocation2] sm:$0xff] (!%p7002_p7), %v544_v0  ;;  %547 = vst [vmem:[#allocation3] sm:$0xff] (!%p7002_p7), %v546_v1 }
  0xef PF: > { %v720_v2 = vld [vmem:[#allocation15] sm:$0xff]  ;;  %v721_v3 = vld [vmem:[#allocation15 + $0x8] sm:$0xff]  ;;  %v722_v4 = vld [vmem:[#allocation15 + $0x10] sm:$0xff]  ;;  %v5821_v5 = vmov 0.0|0.0   ;;  %vm5822_vm0 = vmmov 0   ;;  %v5823_v8 = vmov 0.0  }
  0xf0   : > { %4758 = vmatprep.subr.bf16.mxu1 %v5821_v5  ;;  %v6192_v6 = vpack.c.bf16 %v721_v3, %v720_v2  ;;  %v723_v7 = vld [vmem:[#allocation15 + $0x18] sm:$0xff]  ;;  %3918 = vmatprep.mubr.msk.f32.mxu1 %vm5822_vm0, %v5823_v8  ;;  %v724_v10 = vld [vmem:[#allocation15 + $0x20] sm:$0xff]  ;;  %v725_v11 = vld [vmem:[#allocation15 + $0x28] sm:$0xff]  ;;  %s7003_s3 = sld [smem:[#allocation29_spill]]  ;;  %s7004_s29 = sld [smem:[#allocation31_spill]] }
  0xf1   : > { %v6197_v9 = vpack.c.bf16 %v723_v7, %v722_v4  ;;  %v6200_v12 = vld [vmem:[#allocation3] sm:$0xff]  ;;  %v687_v13 = vld [vmem:[%s6169_s30] sm:$0xff]  ;;  %v6208_v16 = vld [vmem:[#allocation2] sm:$0xff]  ;;  %v6216_v18 = vpack.c.bf16 %v725_v11, %v724_v10  ;;  %s5824_s11 = smov [#allocation17]   ;;  %s3409_s13 = sshll.u32 %s5920_s14, 10 }
  0xf2   : > { %4760 = vmatpush3.bf16.msra.mxu1 %v6192_v6  ;;  %v726_v14 = vld [vmem:[#allocation15 + $0x30] sm:$0xff]  ;;  %v6213_v17 = vld [vmem:[%s6953_s4] ss:$0 sm:$0xff]  ;;  %3874 = vmatprep.mubr.f32.mxu0 %v687_v13  ;;  %v557_v22 = vld [vmem:[#allocation10 + $0x8] sm:$0xff]  ;;  %s3165_s22 = sshll.u32 %s5824_s11, 4  ;;  %s3151_s20 = sshll.u32 %s6187_s15, 4  ;;  %s3166_s22 = int_to_ptr.vmem [resolvable:$true] %s3165_s22  ;;  %s6857_s20 = int_to_ptr.vmem [resolvable:$true] %s3151_s20 }
  0xf3   : > { %4761 = vmatprep.subr.bf16.mxu1 %v5821_v5  ;;  %v6222_v20 = vld [vmem:[%s6954_s5] ss:$0 sm:$0xff]  ;;  %v727_v23 = vld [vmem:[#allocation15 + $0x38] sm:$0xff]  ;;  %v558_v26 = vld [vmem:[#allocation10 + $0x10] sm:$0xff]  ;;  %v705_v28 = vmul.f32 %v6213_v17, %v6208_v16  ;;  %s5825_s6 = smov [#allocation19]   ;;  %s7005_s18 = sld [smem:[#allocation32_spill]] }
  0xf4   : > { %v556_v21 = vld [vmem:[#allocation10] sm:$0xff]  ;;  %v716_v24 = vmul.f32 %v6222_v20, %v6200_v12  ;;  %v559_v27 = vld [vmem:[#allocation10 + $0x18] sm:$0xff]  ;;  %v561_v31 = vld [vmem:[#allocation10 + $0x28] sm:$0xff]  ;;  %v6230_v32 = vpack.c.bf16 %v727_v23, %v726_v14  ;;  %s3176_s17 = sshll.u32 %s5825_s6, 4  ;;  %s5676_s12 = scalar_lea.vmem %s3166_s22, 128  ;;  %s6860_s17 = int_to_ptr.vmem [resolvable:$true] %s3176_s17 }
  0xf5   : > { %v4726_v25 = vpack.c.bf16 %v557_v22, %v556_v21  ;;  %v4730_v29 = vpack.c.bf16 %v559_v27, %v558_v26  ;;  %v560_v30 = vld [vmem:[#allocation10 + $0x20] sm:$0xff]  ;;  %v729_v34 = vld [vmem:[#allocation15 + $0x48] sm:$0xff]  ;;  %v562_v36 = vld [vmem:[#allocation10 + $0x30] sm:$0xff]  ;;  %p5677_p12 = scmp.ne.s32.totalorder %s3166_s22, %s5676_s12  ;;  %p7006_p6 = scmp.eq.s32.totalorder %s5920_s14, 1 }
  0xf6   : > { %v6206_v15 = vld [vmem:[%s7003_s3] ss:$0 sm:$0xff]  ;;  %4763 = vmatpush3.bf16.msra.mxu1 %v6197_v9  ;;  %717 = vadd.xlane.f32.xlu1 %v716_v24  ;;  %v4734_v35 = vpack.c.bf16 %v561_v31, %v560_v30  ;;  %v563_v37 = vld [vmem:[#allocation10 + $0x38] sm:$0xff]  ;;  %v730_v39 = vld [vmem:[#allocation15 + $0x50] sm:$0xff]  ;;  %p5683_p1 = scmp.lt.s32.totalorder %s3166_s22, %s3166_s22  ;;  %p5684_p4 = scmp.lt.s32.totalorder %s5676_s12, %s5676_s12 }
  0xf7   : > { %v695_v19 = vmul.f32 %v6206_v15, %v687_v13  ;;  %4764 = vmatprep.subr.bf16.mxu1 %v5821_v5  ;;  %4727 = vmatprep.subr.bf16.mxu0 %v4726_v25  ;;  %v728_v33 = vld [vmem:[#allocation15 + $0x40] sm:$0xff]  ;;  %v731_v40 = vld [vmem:[#allocation15 + $0x58] sm:$0xff]  ;;  %v4738_v41 = vpack.c.bf16 %v563_v37, %v562_v36  ;;  %v565_v43 = vld [vmem:[#allocation10 + $0x48] sm:$0xff]  ;;  %p5678_p8 = pnand %p5677_p12, %p7006_p6 }
  0xf8   : > { %4729 = vmatpush3.bf16.msra.mxu0 %v4726_v25  ;;  %v6234_v38 = vpack.c.bf16 %v729_v34, %v728_v33  ;;  %v564_v42 = vld [vmem:[#allocation10 + $0x40] sm:$0xff]  ;;  %v6238_v44 = vpack.c.bf16 %v731_v40, %v730_v39  ;;  %v733_v46 = vld [vmem:[#allocation15 + $0x68] sm:$0xff]  ;;  %v566_v48 = vld [vmem:[#allocation10 + $0x50] sm:$0xff]  ;;  %p5685_p5 = por %p5684_p4, %p5683_p1 }
  0xf9   : > { %696 = vadd.xlane.f32.xlu0 %v695_v19  ;;  %4731 = vmatprep.subr.bf16.mxu0 %v4730_v29  ;;  %v732_v45 = vld [vmem:[#allocation15 + $0x60] sm:$0xff]  ;;  %v4742_v47 = vpack.c.bf16 %v565_v43, %v564_v42  ;;  %v567_v49 = vld [vmem:[#allocation10 + $0x58] sm:$0xff]  ;;  %v734_v51 = vld [vmem:[#allocation15 + $0x70] sm:$0xff]  ;;  %s6855_s23 = scalar_lea.hbm %s7005_s18, %s3409_s13  ;;  %p5679_p3 = pneg %p5678_p8 }
  0xfa   : > { %4766 = vmatpush3.bf16.msra.mxu1 %v6216_v18  ;;  %v6242_v50 = vpack.c.bf16 %v733_v46, %v732_v45  ;;  %v735_v52 = vld [vmem:[#allocation15 + $0x78] sm:$0xff]  ;;  %v4746_v53 = vpack.c.bf16 %v567_v49, %v566_v48  ;;  %v568_v54 = vld [vmem:[#allocation10 + $0x60] sm:$0xff]  ;;  %v569_v55 = vld [vmem:[#allocation10 + $0x68] sm:$0xff] }
  0xfb   : > { %4767 = vmatprep.subr.bf16.mxu1 %v5821_v5  ;;  %v6246_v56 = vpack.c.bf16 %v735_v52, %v734_v51  ;;  %v4750_v57 = vpack.c.bf16 %v569_v55, %v568_v54  ;;  %v902_v58 = vld [vmem:[#allocation13] sm:$0xff]  ;;  %v903_v59 = vld [vmem:[#allocation13 + $0x8] sm:$0xff]  ;;  %v570_v60 = vld [vmem:[#allocation10 + $0x70] sm:$0xff]  ;;  %p5686_p13 = pnand %p5685_p5, %p5679_p3 }
  0xfc   : > { %4733 = vmatpush3.bf16.msra.mxu0 %v4730_v29  ;;  %v571_v61 = vld [vmem:[#allocation10 + $0x78] sm:$0xff]  ;;  %v6250_v62 = vpack.c.bf16 %v903_v59, %v902_v58  ;;  %v904_v0 = vld [vmem:[#allocation13 + $0x10] sm:$0xff]  ;;  %v815_v3 = vld [vmem:[#allocation12] sm:$0xff] }
  0xfd   : > { %706 = vadd.xlane.f32.xlu0 %v705_v28  ;;  %4735 = vmatprep.subr.bf16.mxu0 %v4734_v35  ;;  %v4754_v63 = vpack.c.bf16 %v571_v61, %v570_v60  ;;  %v905_v1 = vld [vmem:[#allocation13 + $0x18] sm:$0xff]  ;;  %v816_v4 = vld [vmem:[#allocation12 + $0x8] sm:$0xff]  ;;  %v906_v7 = vld [vmem:[#allocation13 + $0x20] sm:$0xff] }
  0xfe   : > { %4769 = vmatpush3.bf16.msra.mxu1 %v6230_v32  ;;  %v6255_v2 = vpack.c.bf16 %v905_v1, %v904_v0  ;;  %v907_v10 = vld [vmem:[#allocation13 + $0x28] sm:$0xff]  ;;  %v6261_v11 = vld [vmem:[%s6169_s30 + $0x8] sm:$0xff]  ;;  %v817_v13 = vld [vmem:[#allocation12 + $0x10] sm:$0xff] }
  0xff   : > { %4770 = vmatprep.subr.bf16.mxu1 %v5821_v5  ;;  %v818_v14 = vld [vmem:[#allocation12 + $0x18] sm:$0xff]  ;;  %v6268_v19 = vld [vmem:[%s6169_s30 + $0x10] sm:$0xff]  ;;  %v6271_v21 = vpack.c.bf16 %v907_v10, %v906_v7  ;;  %v908_v22 = vld [vmem:[#allocation13 + $0x30] sm:$0xff] }
 0x100   : > { %4737 = vmatpush3.bf16.msra.mxu0 %v4734_v35  ;;  %v909_v23 = vld [vmem:[#allocation13 + $0x38] sm:$0xff]  ;;  %v6275_v24 = vpack.c.bf16 %v818_v14, %v817_v13  ;;  %v6279_v25 = vld [vmem:[%s6169_s30 + $0x18] sm:$0xff]  ;;  %v819_v26 = vld [vmem:[#allocation12 + $0x20] sm:$0xff] }
 0x101   : > { %4739 = vmatprep.subr.bf16.mxu0 %v4738_v41  ;;  %v820_v27 = vld [vmem:[#allocation12 + $0x28] sm:$0xff]  ;;  %v552_v28 = vld [vmem:[%s6169_s30 + $0x20] sm:$0xff]  ;;  %v6284_v29 = vpack.c.bf16 %v909_v23, %v908_v22  ;;  %v910_v30 = vld [vmem:[#allocation13 + $0x40] sm:$0xff] }
 0x102   : > { %4772 = vmatpush3.bf16.msra.mxu1 %v6234_v38  ;;  %v911_v31 = vld [vmem:[#allocation13 + $0x48] sm:$0xff]  ;;  %v6289_v33 = vpack.c.bf16 %v820_v27, %v819_v26  ;;  %v553_v34 = vld [vmem:[%s6169_s30 + $0x28] sm:$0xff]  ;;  %v821_v35 = vld [vmem:[#allocation12 + $0x30] sm:$0xff] }
 0x103   : > { %4773 = vmatprep.subr.bf16.mxu1 %v5821_v5  ;;  %v822_v36 = vld [vmem:[#allocation12 + $0x38] sm:$0xff]  ;;  %v554_v37 = vld [vmem:[%s6169_s30 + $0x30] sm:$0xff]  ;;  %v6295_v39 = vpack.c.bf16 %v911_v31, %v910_v30  ;;  %v912_v40 = vld [vmem:[#allocation13 + $0x50] sm:$0xff] }
 0x104   : > { %4741 = vmatpush3.bf16.msra.mxu0 %v4738_v41  ;;  %v913_v41 = vld [vmem:[#allocation13 + $0x58] sm:$0xff]  ;;  %v6299_v42 = vpack.c.bf16 %v822_v36, %v821_v35  ;;  %v555_v43 = vld [vmem:[%s6169_s30 + $0x38] sm:$0xff]  ;;  %v823_v45 = vld [vmem:[#allocation12 + $0x40] sm:$0xff] }
 0x105   : > { %4743 = vmatprep.subr.bf16.mxu0 %v4742_v47  ;;  %v824_v46 = vld [vmem:[#allocation12 + $0x48] sm:$0xff]  ;;  %v914_v48 = vld [vmem:[#allocation13 + $0x60] sm:$0xff]  ;;  %v825_v52 = vld [vmem:[#allocation12 + $0x50] sm:$0xff] }
 0x106   : > { %4775 = vmatpush3.bf16.msra.mxu1 %v6238_v44  ;;  %v915_v49 = vld [vmem:[#allocation13 + $0x68] sm:$0xff]  ;;  %v6308_v51 = vpack.c.bf16 %v824_v46, %v823_v45  ;;  %v829_v60 = vld [vmem:[#allocation12 + $0x70] sm:$0xff]  ;;  %v830_v61 = vld [vmem:[#allocation12 + $0x78] sm:$0xff] }
 0x107   : > { %4776 = vmatprep.subr.bf16.mxu1 %v5821_v5  ;;  %v6314_v54 = vpack.c.bf16 %v915_v49, %v914_v48  ;;  %v828_v58 = vld [vmem:[#allocation12 + $0x68] sm:$0xff]  ;;  %v917_v0 = vld [vmem:[#allocation13 + $0x78] sm:$0xff]  ;;  %v6361_v22 = vld [vmem:[%s7004_s29] ss:$0 sm:$0xff] }
 0x108   : > { %4745 = vmatpush3.bf16.msra.mxu0 %v4742_v47  ;;  %v6304_v47 = vpack.c.bf16 %v913_v41, %v912_v40 }
 0x109   : > { %4747 = vmatprep.subr.bf16.mxu0 %v4746_v53 }
 0x10a   : > { %4778 = vmatpush3.bf16.msra.mxu1 %v6242_v50 }
 0x10b   : > { %4779 = vmatprep.subr.bf16.mxu1 %v5821_v5 }
 0x10c   : > { %4749 = vmatpush3.bf16.msra.mxu0 %v4746_v53  ;;  %v826_v53 = vld [vmem:[#allocation12 + $0x58] sm:$0xff] }
 0x10d   : > { %4751 = vmatprep.subr.bf16.mxu0 %v4750_v57  ;;  %v6318_v55 = vpack.c.bf16 %v826_v53, %v825_v52 }
 0x10e   : > { %4781 = vmatpush3.bf16.msra.mxu1 %v6246_v56 }
 0x10f   : > { %4806 = vmatprep.subr.bf16.mxu1 %v5821_v5 }
 0x110   : > { %4753 = vmatpush3.bf16.msra.mxu0 %v4750_v57  ;;  %v827_v57 = vld [vmem:[#allocation12 + $0x60] sm:$0xff] }
 0x111   : > { %3919 = vmatmul.mubr.f32.vlgmr.msra.gmra.mrb[0].mxu1 %v6200_v12  ;;  %4755 = vmatprep.subr.bf16.mxu0 %v4754_v63  ;;  %v6263_v12 = vpack.c.bf16 %v816_v4, %v815_v3  ;;  %v6324_v59 = vpack.c.bf16 %v828_v58, %v827_v57  ;;  %v1000_v3 = vmul.f32 %v6206_v15, %v6261_v11 }
 0x112   : > { %4808 = vmatpush3.bf16.msra.mxu1 %v6250_v62  ;;  %3988 = vmatprep.mubr.msk.f32.mxu1 %vm5822_vm0, %v5823_v8 }
 0x113   : > { %4809 = vmatprep.subr.bf16.mxu1 %v5821_v5  ;;  %1001 = vadd.xlane.f32.xlu1 %v1000_v3 }
 0x114   : > { %4757 = vmatpush3.bf16.msra.mxu0 %v4754_v63  ;;  %v6328_v63 = vpack.c.bf16 %v830_v61, %v829_v60  ;;  %v1306_v61 = vmul.f32 %v6206_v15, %v6268_v19 }
 0x115   : > { %4782 = vmatprep.subr.bf16.mxu0 %v5821_v5 }
 0x116   : > { %4811 = vmatpush3.bf16.msra.mxu1 %v6255_v2 }
 0x117   : > { %4812 = vmatprep.subr.bf16.mxu1 %v5821_v5  ;;  %3875 = vmatmul.mubr.f32.vlgmr.msra.gmra.mrb[0].mxu0 %v6261_v11 }
 0x118   : > { %4784 = vmatpush3.bf16.msra.mxu0 %v6263_v12  ;;  %3877 = vmatprep.mubr.f32.mxu0 %v6268_v19 }
 0x119   : > { %4785 = vmatprep.subr.bf16.mxu0 %v5821_v5 }
 0x11a   : > { %4814 = vmatpush3.bf16.msra.mxu1 %v6271_v21 }
 0x11b   : > { %4815 = vmatprep.subr.bf16.mxu1 %v5821_v5  ;;  %3878 = vmatmul.mubr.f32.gmra.mrb[2].mxu0 %v6279_v25 }
 0x11c   : > { %4787 = vmatpush3.bf16.msra.mxu0 %v6275_v24  ;;  %3880 = vmatprep.mubr.f32.mxu0 %v552_v28 }
 0x11d   : > { %4788 = vmatprep.subr.bf16.mxu0 %v5821_v5 }
 0x11e   : > { %4817 = vmatpush3.bf16.msra.mxu1 %v6284_v29 }
 0x11f   : > { %4818 = vmatprep.subr.bf16.mxu1 %v5821_v5  ;;  %3881 = vmatmul.mubr.f32.gmra.mrb[4].mxu0 %v553_v34 }
 0x120   : > { %4790 = vmatpush3.bf16.msra.mxu0 %v6289_v33  ;;  %3883 = vmatprep.mubr.f32.mxu0 %v554_v37 }
 0x121   : > { %4791 = vmatprep.subr.bf16.mxu0 %v5821_v5 }
 0x122   : > { %4820 = vmatpush3.bf16.msra.mxu1 %v6295_v39 }
 0x123   : > { %4821 = vmatprep.subr.bf16.mxu1 %v5821_v5  ;;  %3884 = vmatmul.mubr.f32.gmra.mrb[6].mxu0 %v555_v43 }
 0x124   : > { %4793 = vmatpush3.bf16.msra.mxu0 %v6299_v42  ;;  %3953 = vmatprep.mubr.msk.f32.mxu0 %vm5822_vm0, %v5823_v8 }
 0x125   : > { %4794 = vmatprep.subr.bf16.mxu0 %v5821_v5 }
 0x126   : > { %4823 = vmatpush3.bf16.msra.mxu1 %v6304_v47 }
 0x127   : > { %4824 = vmatprep.subr.bf16.mxu1 %v5821_v5 }
 0x128   : > { %4796 = vmatpush3.bf16.msra.mxu0 %v6308_v51 }
 0x129   : > { %4797 = vmatprep.subr.bf16.mxu0 %v5821_v5 }
 0x12a   : > { %4826 = vmatpush3.bf16.msra.mxu1 %v6314_v54 }
 0x12b   : > { %4827 = vmatprep.subr.bf16.mxu1 %v5821_v5 }
 0x12c   : > { %4799 = vmatpush3.bf16.msra.mxu0 %v6318_v55 }
 0x12d   : > { %4800 = vmatprep.subr.bf16.mxu0 %v5821_v5 }
 0x130   : > { %4802 = vmatpush3.bf16.msra.mxu0 %v6324_v59 }
 0x131   : > { %4803 = vmatprep.subr.bf16.mxu0 %v5821_v5 }
 0x134   : > { %4805 = vmatpush3.bf16.msra.mxu0 %v6328_v63 }
 0x135   : > { %4830 = vmatprep.subr.bf16.mxu0 %v5821_v5 }
 0x137   : > { %3954 = vmatmul.mubr.f32.vlgmr.msra.gmra.mrb[8].mxu0 %v6208_v16  ;;  %v916_v16 = vld [vmem:[#allocation13 + $0x70] sm:$0xff] }
 0x138   : > { %4832 = vmatpush3.bf16.msra.mxu0 %v6192_v6  ;;  %4023 = vmatprep.mubr.msk.f32.mxu0 %vm5822_vm0, %v5823_v8  ;;  %v6352_v1 = vpack.c.bf16 %v917_v0, %v916_v16 }
 0x139   : > { %4833 = vmatprep.subr.bf16.mxu0 %v5821_v5 }
 0x13a   : > { %4829 = vmatpush3.bf16.msra.mxu1 %v6352_v1 }
 0x13b   : > { %4854 = vmatprep.subr.bf16.mxu1 %v5821_v5 }
 0x13c   : > { %4835 = vmatpush3.bf16.msra.mxu0 %v6197_v9 }
 0x13d   : > { %4836 = vmatprep.subr.bf16.mxu0 %v5821_v5 }
 0x140   : > { %4838 = vmatpush3.bf16.msra.mxu0 %v6216_v18 }
 0x141   : > { %4839 = vmatprep.subr.bf16.mxu0 %v5821_v5 }
 0x144   : > { %4841 = vmatpush3.bf16.msra.mxu0 %v6230_v32 }
 0x145   : > { %4842 = vmatprep.subr.bf16.mxu0 %v5821_v5 }
 0x148   : > { %4844 = vmatpush3.bf16.msra.mxu0 %v6234_v38 }
 0x149   : > { %4845 = vmatprep.subr.bf16.mxu0 %v5821_v5 }
 0x14c   : > { %4847 = vmatpush3.bf16.msra.mxu0 %v6238_v44 }
 0x14d   : > { %4848 = vmatprep.subr.bf16.mxu0 %v5821_v5 }
 0x150   : > { %4850 = vmatpush3.bf16.msra.mxu0 %v6242_v50 }
 0x151   : > { %4851 = vmatprep.subr.bf16.mxu0 %v5821_v5 }
 0x154   : > { %4853 = vmatpush3.bf16.msra.mxu0 %v6246_v56 }
 0x155   : > { %4878 = vmatprep.subr.bf16.mxu0 %v5821_v5 }
 0x183   : > { %v718_v13 = vpop.xlane.xlu1 %717 }
 0x186   : > { %v697_v4 = vpop.xlane.xlu0 %696 }
 0x18a   : > { %v707_v7 = vpop.xlane.xlu0 %706 }
 0x18b   : > { %v708_v10 = vadd.f32 %v707_v7, %v697_v4 }
 0x18d   : > { %v719_v14 = vadd.f32 %v718_v13, %v708_v10 }
 0x18f   : > { %v743_v23 = vmul.f32 %v6361_v22, %v719_v14 }
 0x1a0   : > { %v1002_v16 = vpop.xlane.xlu1 %1001 }
 0x1e4   : > { %v810_v26 = vpop.f32.mrb[0].mxu1 }
 0x1e5   : > { %v811_v27 = vadd.f32 %v810_v26, %v743_v23  ;;  %v3920_v11 = vpop.f32.mrb[1].mxu1 }
 0x1e7   : > { %3989 = vmatmul.mubr.f32.vlgmr.msra.gmra.mrb[2].mxu1 %v811_v27  ;;  %4024 = vmatmul.mubr.f32.vlgmr.msra.gmra.mrb[10].mxu0 %v811_v27  ;;  %v1021_v28 = vmul.f32 %v6222_v20, %v811_v27 }
 0x1e8   : > { %4856 = vmatpush3.bf16.msra.mxu1 %v6263_v12  ;;  %4058 = vmatprep.mubr.msk.f32.mxu1 %vm5822_vm0, %v5823_v8 }
 0x1e9   : > { %1022 = vadd.xlane.f32.xlu1 %v1021_v28  ;;  %4857 = vmatprep.subr.bf16.mxu1 %v5821_v5 }
 0x1ea   : > { %4880 = vmatpush3.bf16.msra.mxu0 %v6250_v62  ;;  %4093 = vmatprep.mubr.msk.f32.mxu0 %vm5822_vm0, %v5823_v8  ;;  %v6383_v30 = vpop.f32.mrb[0].mxu0 }
 0x1eb   : > { %4881 = vmatprep.subr.bf16.mxu0 %v5821_v5  ;;  %v638_v31 = vpop.f32.mrb[1].mxu0 }
 0x1ec   : > { %4859 = vmatpush3.bf16.msra.mxu1 %v6275_v24 }
 0x1ed   : > { %4860 = vmatprep.subr.bf16.mxu1 %v5821_v5 }
 0x1ee   : > { %4883 = vmatpush3.bf16.msra.mxu0 %v6255_v2  ;;  %v6387_v34 = vpop.f32.mrb[2].mxu0 }
 0x1ef   : > { %4884 = vmatprep.subr.bf16.mxu0 %v5821_v5  ;;  %v6390_v35 = vpop.f32.mrb[3].mxu0 }
 0x1f0   : > { %4862 = vmatpush3.bf16.msra.mxu1 %v6289_v33 }
 0x1f1   : > { %4863 = vmatprep.subr.bf16.mxu1 %v5821_v5 }
 0x1f2   : > { %4886 = vmatpush3.bf16.msra.mxu0 %v6271_v21  ;;  %v3882_v36 = vpop.f32.mrb[4].mxu0 }
 0x1f3   : > { %4887 = vmatprep.subr.bf16.mxu0 %v5821_v5  ;;  %682 = vst [vmem:[%s6187_s15 + $0x28] sm:$0xff] %v3882_v36  ;;  %v658_v37 = vpop.f32.mrb[5].mxu0  ;;  %v1652_v36 = vld [vmem:[#allocation15 + $0x78] sm:$0xff] }
 0x1f4   : > { %4865 = vmatpush3.bf16.msra.mxu1 %v6299_v42  ;;  %681 = vst [vmem:[%s6187_s15 + $0x20] sm:$0xff] %v658_v37 }
 0x1f5   : > { %4866 = vmatprep.subr.bf16.mxu1 %v5821_v5 }
 0x1f6   : > { %4889 = vmatpush3.bf16.msra.mxu0 %v6284_v29  ;;  %v3885_v40 = vpop.f32.mrb[6].mxu0 }
 0x1f7   : > { %4890 = vmatprep.subr.bf16.mxu0 %v5821_v5  ;;  %684 = vst [vmem:[%s6187_s15 + $0x38] sm:$0xff] %v3885_v40  ;;  %v668_v41 = vpop.f32.mrb[7].mxu0 }
 0x1f8   : > { %4868 = vmatpush3.bf16.msra.mxu1 %v6308_v51  ;;  %683 = vst [vmem:[%s6187_s15 + $0x30] sm:$0xff] %v668_v41 }
 0x1f9   : > { %4869 = vmatprep.subr.bf16.mxu1 %v5821_v5 }
 0x1fa   : > { %4892 = vmatpush3.bf16.msra.mxu0 %v6295_v39 }
 0x1fb   : > { %4893 = vmatprep.subr.bf16.mxu0 %v5821_v5 }
 0x1fc   : > { %4871 = vmatpush3.bf16.msra.mxu1 %v6318_v55 }
 0x1fd   : > { %4872 = vmatprep.subr.bf16.mxu1 %v5821_v5 }
 0x1fe   : > { %4895 = vmatpush3.bf16.msra.mxu0 %v6304_v47 }
 0x1ff   : > { %4896 = vmatprep.subr.bf16.mxu0 %v5821_v5 }
 0x200   : > { %4874 = vmatpush3.bf16.msra.mxu1 %v6324_v59 }
 0x201   : > { %4875 = vmatprep.subr.bf16.mxu1 %v5821_v5 }
 0x202   : > { %4898 = vmatpush3.bf16.msra.mxu0 %v6314_v54 }
 0x203   : > { %4899 = vmatprep.subr.bf16.mxu0 %v5821_v5 }
 0x204   : > { %4877 = vmatpush3.bf16.msra.mxu1 %v6328_v63 }
 0x205   : > { %4902 = vmatprep.subr.bf16.mxu1 %v5821_v5 }
 0x206   : > { %4901 = vmatpush3.bf16.msra.mxu0 %v6352_v1 }
 0x207   : > { %4926 = vmatprep.subr.bf16.mxu0 %v5821_v5 }
 0x20a   : > { %v897_v43 = vpop.f32.mrb[8].mxu0 }
 0x20b   : > { %v901_v45 = vadd.f32 %v897_v43, %v638_v31  ;;  %v3955_v46 = vpop.f32.mrb[9].mxu0 }
 0x276   : > { %v1023_v4 = vpop.xlane.xlu1 %1022 }
 0x2ba   : > { %v984_v48 = vpop.f32.mrb[2].mxu1  ;;  %v1115_v49 = vpop.f32.mrb[10].mxu0 }
 0x2bb   : > { %v988_v52 = vadd.f32 %v984_v48, %v901_v45  ;;  %v3990_v53 = vpop.f32.mrb[3].mxu1  ;;  %v4025_v57 = vpop.f32.mrb[11].mxu0  ;;  %v6509_v48 = vld [vmem:[%s6954_s5] ss:$0 sm:$0xff] }
 0x2bc   : > { %v1947_v53 = vld [vmem:[#allocation15 + $0x20] sm:$0xff]  ;;  %v1948_v57 = vld [vmem:[#allocation15 + $0x28] sm:$0xff] }
 0x2bd   : > { %5462 = vtanh.f32 %v988_v52 }
 0x2c7   : > { %v5463_v58 = vpop.eup %5462 }
 0x2c8   : > { %990 = vst [vmem:[%s6187_s15] sm:$0xff] %v5463_v58  ;;  %4059 = vmatmul.mubr.f32.vlgmr.msra.gmra.mrb[4].mxu1 %v5463_v58  ;;  %v1010_v60 = vmul.f32 %v5463_v58, %v6213_v17  ;;  %v6565_v58 = vpack.c.bf16 %v1948_v57, %v1947_v53  ;;  %v2132_v57 = vld [vmem:[#allocation13 + $0x30] sm:$0xff] }
 0x2c9   : > { %4904 = vmatpush3.bf16.msra.mxu1 %v6192_v6  ;;  %4128 = vmatprep.mubr.msk.f32.mxu1 %vm5822_vm0, %v5823_v8 }
 0x2ca   : > { %1011 = vadd.xlane.f32.xlu0 %v1010_v60  ;;  %4905 = vmatprep.subr.bf16.mxu1 %v5821_v5  ;;  %v1949_v60 = vld [vmem:[#allocation15 + $0x30] sm:$0xff] }
 0x2cd   : > { %4907 = vmatpush3.bf16.msra.mxu1 %v6197_v9 }
 0x2ce   : > { %4908 = vmatprep.subr.bf16.mxu1 %v5821_v5  ;;  %1307 = vadd.xlane.f32.xlu0 %v1306_v61  ;;  %v1950_v61 = vld [vmem:[#allocation15 + $0x38] sm:$0xff] }
 0x2d1   : > { %4910 = vmatpush3.bf16.msra.mxu1 %v6216_v18 }
 0x2d2   : > { %4911 = vmatprep.subr.bf16.mxu1 %v5821_v5 }
 0x2d5   : > { %4913 = vmatpush3.bf16.msra.mxu1 %v6230_v32 }
 0x2d6   : > { %4914 = vmatprep.subr.bf16.mxu1 %v5821_v5 }
 0x2d9   : > { %4916 = vmatpush3.bf16.msra.mxu1 %v6234_v38 }
 0x2da   : > { %4917 = vmatprep.subr.bf16.mxu1 %v5821_v5 }
 0x2dd   : > { %4919 = vmatpush3.bf16.msra.mxu1 %v6238_v44 }
 0x2de   : > { %4920 = vmatprep.subr.bf16.mxu1 %v5821_v5 }
 0x2e1   : > { %4922 = vmatpush3.bf16.msra.mxu1 %v6242_v50 }
 0x2e2   : > { %4923 = vmatprep.subr.bf16.mxu1 %v5821_v5 }
 0x2e5   : > { %4925 = vmatpush3.bf16.msra.mxu1 %v6246_v56 }
 0x2e6   : > { %4950 = vmatprep.subr.bf16.mxu1 %v5821_v5 }
 0x357   : > { %v1012_v0 = vpop.xlane.xlu0 %1011 }
 0x358   : > { %v1013_v3 = vadd.f32 %v1012_v0, %v1002_v16  ;;  %v6569_v16 = vpack.c.bf16 %v1950_v61, %v1949_v60  ;;  %v1951_v0 = vld [vmem:[#allocation15 + $0x40] sm:$0xff]  ;;  %v2133_v60 = vld [vmem:[#allocation13 + $0x38] sm:$0xff] }
 0x359   : > { %v6636_v61 = vpack.c.bf16 %v2133_v60, %v2132_v57 }
 0x35a   : > { %v1024_v7 = vadd.f32 %v1023_v4, %v1013_v3  ;;  %v1952_v3 = vld [vmem:[#allocation15 + $0x48] sm:$0xff] }
 0x35b   : > { %v6573_v4 = vpack.c.bf16 %v1952_v3, %v1951_v0  ;;  %v2134_v0 = vld [vmem:[#allocation13 + $0x40] sm:$0xff]  ;;  %v2135_v3 = vld [vmem:[#allocation13 + $0x48] sm:$0xff] }
 0x35c   : > { %v1048_v15 = vmul.f32 %v6361_v22, %v1024_v7  ;;  %v3371_v7 = vld [vmem:[%s6169_s30 + $0x20] sm:$0xff] }
 0x35e   : > { %v1116_v19 = vadd.f32 %v1115_v49, %v1048_v15 }
 0x360   : > { %4094 = vmatmul.mubr.f32.vlgmr.msra.gmra.mrb[12].mxu0 %v1116_v19  ;;  %4129 = vmatmul.mubr.f32.vlgmr.msra.gmra.mrb[6].mxu1 %v1116_v19  ;;  %v1327_v44 = vmul.f32 %v6222_v20, %v1116_v19 }
 0x361   : > { %4928 = vmatpush3.bf16.msra.mxu0 %v6263_v12  ;;  %4163 = vmatprep.mubr.msk.f32.mxu0 %vm5822_vm0, %v5823_v8 }
 0x362   : > { %1328 = vadd.xlane.f32.xlu0 %v1327_v44  ;;  %4929 = vmatprep.subr.bf16.mxu0 %v5821_v5 }
 0x363   : > { %4952 = vmatpush3.bf16.msra.mxu1 %v6250_v62  ;;  %4198 = vmatprep.mubr.msk.f32.mxu1 %vm5822_vm0, %v5823_v8 }
 0x364   : > { %4953 = vmatprep.subr.bf16.mxu1 %v5821_v5 }
 0x365   : > { %4931 = vmatpush3.bf16.msra.mxu0 %v6275_v24 }
 0x366   : > { %4932 = vmatprep.subr.bf16.mxu0 %v5821_v5 }
 0x367   : > { %4955 = vmatpush3.bf16.msra.mxu1 %v6255_v2 }
 0x368   : > { %4956 = vmatprep.subr.bf16.mxu1 %v5821_v5 }
 0x369   : > { %4934 = vmatpush3.bf16.msra.mxu0 %v6289_v33 }
 0x36a   : > { %4935 = vmatprep.subr.bf16.mxu0 %v5821_v5 }
 0x36b   : > { %4958 = vmatpush3.bf16.msra.mxu1 %v6271_v21 }
 0x36c   : > { %4959 = vmatprep.subr.bf16.mxu1 %v5821_v5 }
 0x36d   : > { %4937 = vmatpush3.bf16.msra.mxu0 %v6299_v42 }
 0x36e   : > { %4938 = vmatprep.subr.bf16.mxu0 %v5821_v5 }
 0x36f   : > { %4961 = vmatpush3.bf16.msra.mxu1 %v6284_v29 }
 0x370   : > { %4962 = vmatprep.subr.bf16.mxu1 %v5821_v5 }
 0x371   : > { %4940 = vmatpush3.bf16.msra.mxu0 %v6308_v51 }
 0x372   : > { %4941 = vmatprep.subr.bf16.mxu0 %v5821_v5 }
 0x373   : > { %4964 = vmatpush3.bf16.msra.mxu1 %v6295_v39 }
 0x374   : > { %4965 = vmatprep.subr.bf16.mxu1 %v5821_v5 }
 0x375   : > { %4943 = vmatpush3.bf16.msra.mxu0 %v6318_v55 }
 0x376   : > { %4944 = vmatprep.subr.bf16.mxu0 %v5821_v5 }
 0x377   : > { %4967 = vmatpush3.bf16.msra.mxu1 %v6304_v47 }
 0x378   : > { %4968 = vmatprep.subr.bf16.mxu1 %v5821_v5 }
 0x379   : > { %4946 = vmatpush3.bf16.msra.mxu0 %v6324_v59 }
 0x37a   : > { %4947 = vmatprep.subr.bf16.mxu0 %v5821_v5 }
 0x37b   : > { %4970 = vmatpush3.bf16.msra.mxu1 %v6314_v54 }
 0x37c   : > { %4971 = vmatprep.subr.bf16.mxu1 %v5821_v5 }
 0x37d   : > { %4949 = vmatpush3.bf16.msra.mxu0 %v6328_v63 }
 0x37e   : > { %4974 = vmatprep.subr.bf16.mxu0 %v5821_v5 }
 0x37f   : > { %4973 = vmatpush3.bf16.msra.mxu1 %v6352_v1 }
 0x380   : > { %4998 = vmatprep.subr.bf16.mxu1 %v5821_v5 }
 0x39b   : > { %v1203_v20 = vpop.f32.mrb[4].mxu1 }
 0x39c   : > { %v1207_v50 = vadd.f32 %v6383_v30, %v1203_v20  ;;  %v4060_v56 = vpop.f32.mrb[5].mxu1  ;;  %v1649_v30 = vld [vmem:[#allocation15 + $0x60] sm:$0xff] }
 0x433   : > { %v1290_v10 = vpop.f32.mrb[12].mxu0  ;;  %v1421_v13 = vpop.f32.mrb[6].mxu1 }
 0x434   : > { %v1294_v14 = vadd.f32 %v1290_v10, %v1207_v50  ;;  %v4095_v23 = vpop.f32.mrb[13].mxu0  ;;  %v4130_v26 = vpop.f32.mrb[7].mxu1 }
 0x435   : > { %v2039_v23 = vld [vmem:[#allocation12] sm:$0xff]  ;;  %v2040_v26 = vld [vmem:[#allocation12 + $0x8] sm:$0xff] }
 0x436   : > { %5464 = vtanh.f32 %v1294_v14 }
 0x440   : > { %v5465_v27 = vpop.eup %5464 }
 0x441   : > { %3356 = vst [vmem:[%s6187_s15 + $0x8] sm:$0xff] %v5465_v27  ;;  %4164 = vmatmul.mubr.f32.vlgmr.msra.gmra.mrb[14].mxu0 %v5465_v27  ;;  %v1316_v11 = vmul.f32 %v5465_v27, %v6213_v17  ;;  %v1647_v17 = vld [vmem:[#allocation15 + $0x50] sm:$0xff] }
 0x442   : > { %4976 = vmatpush3.bf16.msra.mxu0 %v6192_v6  ;;  %4233 = vmatprep.mubr.msk.f32.mxu0 %vm5822_vm0, %v5823_v8  ;;  %v1648_v6 = vld [vmem:[#allocation15 + $0x58] sm:$0xff]  ;;  %v2041_v27 = vld [vmem:[#allocation12 + $0x10] sm:$0xff] }
 0x443   : > { %1317 = vadd.xlane.f32.xlu1 %v1316_v11  ;;  %4977 = vmatprep.subr.bf16.mxu0 %v5821_v5  ;;  %v6485_v28 = vpack.c.bf16 %v1648_v6, %v1647_v17  ;;  %v6592_v11 = vpack.c.bf16 %v2040_v26, %v2039_v23  ;;  %v2042_v17 = vld [vmem:[#allocation12 + $0x18] sm:$0xff]  ;;  %v2043_v6 = vld [vmem:[#allocation12 + $0x20] sm:$0xff] }
 0x444   : > { %v2138_v26 = vld [vmem:[#allocation13 + $0x60] sm:$0xff] }
 0x446   : > { %4979 = vmatpush3.bf16.msra.mxu0 %v6197_v9  ;;  %v1650_v9 = vld [vmem:[#allocation15 + $0x68] sm:$0xff] }
 0x447   : > { %4980 = vmatprep.subr.bf16.mxu0 %v5821_v5  ;;  %v6496_v31 = vpack.c.bf16 %v1650_v9, %v1649_v30  ;;  %v2044_v30 = vld [vmem:[#allocation12 + $0x28] sm:$0xff] }
 0x448   : > { %v6599_v9 = vpack.c.bf16 %v2044_v30, %v2043_v6  ;;  %v2140_v6 = vld [vmem:[#allocation13 + $0x70] sm:$0xff]  ;;  %v2141_v30 = vld [vmem:[#allocation13 + $0x78] sm:$0xff] }
 0x44a   : > { %4982 = vmatpush3.bf16.msra.mxu0 %v6216_v18  ;;  %v6491_v18 = vld [vmem:[%s7003_s3] ss:$0 sm:$0xff] }
 0x44b   : > { %4983 = vmatprep.subr.bf16.mxu0 %v5821_v5  ;;  %v1918_v15 = vmul.f32 %v3371_v7, %v6491_v18  ;;  %v6640_v7 = vpack.c.bf16 %v2135_v3, %v2134_v0 }
 0x44e   : > { %4985 = vmatpush3.bf16.msra.mxu0 %v6230_v32  ;;  %v1612_v32 = vmul.f32 %v6491_v18, %v6279_v25  ;;  %v1308_v25 = vpop.xlane.xlu0 %1307 }
 0x44f   : > { %4986 = vmatprep.subr.bf16.mxu0 %v5821_v5 }
 0x450   : > { %1613 = vadd.xlane.f32.xlu1 %v1612_v32  ;;  %v2045_v32 = vld [vmem:[#allocation12 + $0x30] sm:$0xff] }
 0x452   : > { %4988 = vmatpush3.bf16.msra.mxu0 %v6234_v38  ;;  %v1651_v38 = vld [vmem:[#allocation15 + $0x70] sm:$0xff]  ;;  %v1329_v43 = vpop.xlane.xlu0 %1328 }
 0x453   : > { %4989 = vmatprep.subr.bf16.mxu0 %v5821_v5  ;;  %v6500_v37 = vpack.c.bf16 %v1652_v36, %v1651_v38  ;;  %v2046_v38 = vld [vmem:[#allocation12 + $0x38] sm:$0xff] }
 0x454   : > { %v6603_v36 = vpack.c.bf16 %v2046_v38, %v2045_v32  ;;  %v6667_v32 = vpack.c.bf16 %v2141_v30, %v2140_v6  ;;  %v3378_v38 = vld [vmem:[%s6169_s30 + $0x28] sm:$0xff] }
 0x456   : > { %4991 = vmatpush3.bf16.msra.mxu0 %v6485_v28 }
 0x457   : > { %4992 = vmatprep.subr.bf16.mxu0 %v5821_v5 }
 0x45a   : > { %4994 = vmatpush3.bf16.msra.mxu0 %v6496_v31 }
 0x45b   : > { %4995 = vmatprep.subr.bf16.mxu0 %v5821_v5 }
 0x45e   : > { %4997 = vmatpush3.bf16.msra.mxu0 %v6500_v37 }
 0x45f   : > { %5022 = vmatprep.subr.bf16.mxu0 %v5821_v5 }
 0x4d0   : > { %v1318_v40 = vpop.xlane.xlu1 %1317 }
 0x4d1   : > { %v1319_v41 = vadd.f32 %v1318_v40, %v1308_v25  ;;  %v2047_v25 = vld [vmem:[#allocation12 + $0x40] sm:$0xff]  ;;  %v2048_v40 = vld [vmem:[#allocation12 + $0x48] sm:$0xff] }
 0x4d3   : > { %v1330_v45 = vadd.f32 %v1329_v43, %v1319_v41  ;;  %v6607_v41 = vpack.c.bf16 %v2048_v40, %v2047_v25  ;;  %v2224_v25 = vmul.f32 %v3378_v38, %v6491_v18 }
 0x4d5   : > { %v1354_v46 = vmul.f32 %v6361_v22, %v1330_v45 }
 0x4d7   : > { %v1422_v49 = vadd.f32 %v1421_v13, %v1354_v46 }
 0x4d9   : > { %4199 = vmatmul.mubr.f32.vlgmr.msra.gmra.mrb[8].mxu1 %v1422_v49  ;;  %4234 = vmatmul.mubr.f32.vlgmr.msra.gmra.mrb[16].mxu0 %v1422_v49  ;;  %v1633_v52 = vmul.f32 %v6509_v48, %v1422_v49  ;;  %v2049_v49 = vld [vmem:[#allocation12 + $0x50] sm:$0xff] }
 0x4da   : > { %5000 = vmatpush3.bf16.msra.mxu1 %v6263_v12  ;;  %4268 = vmatprep.mubr.msk.f32.mxu1 %vm5822_vm0, %v5823_v8 }
 0x4db   : > { %1634 = vadd.xlane.f32.xlu1 %v1633_v52  ;;  %5001 = vmatprep.subr.bf16.mxu1 %v5821_v5  ;;  %v2050_v52 = vld [vmem:[#allocation12 + $0x58] sm:$0xff] }
 0x4dc   : > { %5024 = vmatpush3.bf16.msra.mxu0 %v6250_v62  ;;  %4303 = vmatprep.mubr.msk.f32.mxu0 %vm5822_vm0, %v5823_v8 }
 0x4dd   : > { %5025 = vmatprep.subr.bf16.mxu0 %v5821_v5  ;;  %v1614_v19 = vpop.xlane.xlu1 %1613 }
 0x4de   : > { %5003 = vmatpush3.bf16.msra.mxu1 %v6275_v24 }
 0x4df   : > { %5004 = vmatprep.subr.bf16.mxu1 %v5821_v5 }
 0x4e0   : > { %5027 = vmatpush3.bf16.msra.mxu0 %v6255_v2 }
 0x4e1   : > { %5028 = vmatprep.subr.bf16.mxu0 %v5821_v5 }
 0x4e2   : > { %5006 = vmatpush3.bf16.msra.mxu1 %v6289_v33 }
 0x4e3   : > { %5007 = vmatprep.subr.bf16.mxu1 %v5821_v5 }
 0x4e4   : > { %5030 = vmatpush3.bf16.msra.mxu0 %v6271_v21 }
 0x4e5   : > { %5031 = vmatprep.subr.bf16.mxu0 %v5821_v5 }
 0x4e6   : > { %5009 = vmatpush3.bf16.msra.mxu1 %v6299_v42  ;;  %v1943_v42 = vld [vmem:[#allocation15] sm:$0xff] }
 0x4e7   : > { %5010 = vmatprep.subr.bf16.mxu1 %v5821_v5 }
 0x4e8   : > { %5033 = vmatpush3.bf16.msra.mxu0 %v6284_v29 }
 0x4e9   : > { %5034 = vmatprep.subr.bf16.mxu0 %v5821_v5 }
 0x4ea   : > { %5012 = vmatpush3.bf16.msra.mxu1 %v6308_v51  ;;  %v6552_v51 = vld [vmem:[%s6953_s4] ss:$0 sm:$0xff] }
 0x4eb   : > { %5013 = vmatprep.subr.bf16.mxu1 %v5821_v5 }
 0x4ec   : > { %5036 = vmatpush3.bf16.msra.mxu0 %v6295_v39 }
 0x4ed   : > { %5037 = vmatprep.subr.bf16.mxu0 %v5821_v5 }
 0x4ee   : > { %5015 = vmatpush3.bf16.msra.mxu1 %v6318_v55  ;;  %v1945_v55 = vld [vmem:[#allocation15 + $0x10] sm:$0xff] }
 0x4ef   : > { %5016 = vmatprep.subr.bf16.mxu1 %v5821_v5 }
 0x4f0   : > { %5039 = vmatpush3.bf16.msra.mxu0 %v6304_v47  ;;  %v1944_v47 = vld [vmem:[#allocation15 + $0x8] sm:$0xff] }
 0x4f1   : > { %5040 = vmatprep.subr.bf16.mxu0 %v5821_v5 }
 0x4f2   : > { %5018 = vmatpush3.bf16.msra.mxu1 %v6324_v59  ;;  %v1946_v59 = vld [vmem:[#allocation15 + $0x18] sm:$0xff] }
 0x4f3   : > { %5019 = vmatprep.subr.bf16.mxu1 %v5821_v5 }
 0x4f4   : > { %5042 = vmatpush3.bf16.msra.mxu0 %v6314_v54  ;;  %v6554_v54 = vpack.c.bf16 %v1944_v47, %v1943_v42  ;;  %v2128_v42 = vld [vmem:[#allocation13 + $0x10] sm:$0xff] }
 0x4f5   : > { %5043 = vmatprep.subr.bf16.mxu0 %v5821_v5 }
 0x4f6   : > { %5021 = vmatpush3.bf16.msra.mxu1 %v6328_v63 }
 0x4f7   : > { %5046 = vmatprep.subr.bf16.mxu1 %v5821_v5 }
 0x4f8   : > { %5045 = vmatpush3.bf16.msra.mxu0 %v6352_v1 }
 0x4f9   : > { %5070 = vmatprep.subr.bf16.mxu0 %v5821_v5 }
 0x514   : > { %v1509_v62 = vpop.f32.mrb[14].mxu0 }
 0x515   : > { %v1513_v2 = vadd.f32 %v1509_v62, %v6390_v35  ;;  %v4165_v12 = vpop.f32.mrb[15].mxu0  ;;  %v6559_v35 = vpack.c.bf16 %v1946_v59, %v1945_v55  ;;  %v6613_v62 = vpack.c.bf16 %v2050_v52, %v2049_v49  ;;  %v2129_v55 = vld [vmem:[#allocation13 + $0x18] sm:$0xff]  ;;  %v6682_v49 = vld [vmem:[%s7004_s29] ss:$0 sm:$0xff] }
 0x516   : > { %v2052_v12 = vld [vmem:[#allocation12 + $0x68] sm:$0xff]  ;;  %v6628_v59 = vpack.c.bf16 %v2129_v55, %v2128_v42 }
 0x568   : > { %v1635_v50 = vpop.xlane.xlu1 %1634 }
 0x5ac   : > { %v1596_v21 = vpop.f32.mrb[8].mxu1  ;;  %v1727_v24 = vpop.f32.mrb[16].mxu0 }
 0x5ad   : > { %v1600_v29 = vadd.f32 %v1596_v21, %v1513_v2  ;;  %v4200_v33 = vpop.f32.mrb[9].mxu1  ;;  %v4235_v39 = vpop.f32.mrb[17].mxu0  ;;  %v2051_v2 = vld [vmem:[#allocation12 + $0x60] sm:$0xff] }
 0x5ae   : > { %v6617_v21 = vpack.c.bf16 %v2052_v12, %v2051_v2  ;;  %v2126_v33 = vld [vmem:[#allocation13] sm:$0xff]  ;;  %v2127_v39 = vld [vmem:[#allocation13 + $0x8] sm:$0xff] }
 0x5af   : > { %5466 = vtanh.f32 %v1600_v29  ;;  %v2054_v29 = vld [vmem:[#allocation12 + $0x78] sm:$0xff]  ;;  %v6625_v47 = vpack.c.bf16 %v2127_v39, %v2126_v33  ;;  %v3376_v39 = vld [vmem:[%s6187_s15 + $0x20] sm:$0xff] }
 0x5b9   : > { %v5467_v63 = vpop.eup %5466 }
 0x5ba   : > { %3363 = vst [vmem:[%s6187_s15 + $0x10] sm:$0xff] %v5467_v63  ;;  %4269 = vmatmul.mubr.f32.vlgmr.msra.gmra.mrb[10].mxu1 %v5467_v63  ;;  %v1622_v1 = vmul.f32 %v5467_v63, %v6552_v51  ;;  %v2130_v63 = vld [vmem:[#allocation13 + $0x20] sm:$0xff] }
 0x5bb   : > { %5048 = vmatpush3.bf16.msra.mxu1 %v6554_v54  ;;  %4338 = vmatprep.mubr.msk.f32.mxu1 %vm5822_vm0, %v5823_v8 }
 0x5bc   : > { %1623 = vadd.xlane.f32.xlu0 %v1622_v1  ;;  %5049 = vmatprep.subr.bf16.mxu1 %v5821_v5  ;;  %v2131_v1 = vld [vmem:[#allocation13 + $0x28] sm:$0xff] }
 0x5bd   : > { %v6632_v53 = vpack.c.bf16 %v2131_v1, %v2130_v63 }
 0x5bf   : > { %5051 = vmatpush3.bf16.msra.mxu1 %v6559_v35 }
 0x5c0   : > { %5052 = vmatprep.subr.bf16.mxu1 %v5821_v5  ;;  %1919 = vadd.xlane.f32.xlu0 %v1918_v15  ;;  %v2136_v15 = vld [vmem:[#allocation13 + $0x50] sm:$0xff] }
 0x5c3   : > { %5054 = vmatpush3.bf16.msra.mxu1 %v6565_v58 }
 0x5c4   : > { %5055 = vmatprep.subr.bf16.mxu1 %v5821_v5 }
 0x5c7   : > { %5057 = vmatpush3.bf16.msra.mxu1 %v6569_v16 }
 0x5c8   : > { %5058 = vmatprep.subr.bf16.mxu1 %v5821_v5 }
 0x5cb   : > { %5060 = vmatpush3.bf16.msra.mxu1 %v6573_v4 }
 0x5cc   : > { %5061 = vmatprep.subr.bf16.mxu1 %v5821_v5 }
 0x5cf   : > { %5063 = vmatpush3.bf16.msra.mxu1 %v6485_v28 }
 0x5d0   : > { %5064 = vmatprep.subr.bf16.mxu1 %v5821_v5 }
 0x5d3   : > { %5066 = vmatpush3.bf16.msra.mxu1 %v6496_v31 }
 0x5d4   : > { %5067 = vmatprep.subr.bf16.mxu1 %v5821_v5 }
 0x5d7   : > { %5069 = vmatpush3.bf16.msra.mxu1 %v6500_v37 }
 0x5d8   : > { %5094 = vmatprep.subr.bf16.mxu1 %v5821_v5 }
 0x649   : > { %v1624_v44 = vpop.xlane.xlu0 %1623 }
 0x64a   : > { %v1625_v20 = vadd.f32 %v1624_v44, %v1614_v19  ;;  %v2137_v19 = vld [vmem:[#allocation13 + $0x58] sm:$0xff] }
 0x64b   : > { %v6644_v44 = vpack.c.bf16 %v2137_v19, %v2136_v15  ;;  %v3385_v15 = vld [vmem:[%s6169_s30 + $0x30] sm:$0xff] }
 0x64c   : > { %v1636_v56 = vadd.f32 %v1635_v50, %v1625_v20  ;;  %v2530_v19 = vmul.f32 %v3385_v15, %v6491_v18  ;;  %v3397_v15 = vld [vmem:[%s6187_s15 + $0x38] sm:$0xff] }
 0x64d   : > { %v1920_v40 = vpop.xlane.xlu0 %1919 }
 0x64e   : > { %v1660_v10 = vmul.f32 %v6361_v22, %v1636_v56  ;;  %v6595_v22 = vpack.c.bf16 %v2042_v17, %v2041_v27  ;;  %v2139_v27 = vld [vmem:[#allocation13 + $0x68] sm:$0xff] }
 0x64f   : > { %v6661_v17 = vpack.c.bf16 %v2139_v27, %v2138_v26 }
 0x650   : > { %v1728_v13 = vadd.f32 %v1727_v24, %v1660_v10  ;;  %v2053_v24 = vld [vmem:[#allocation12 + $0x70] sm:$0xff] }
 0x652   : > { %4304 = vmatmul.mubr.f32.vlgmr.msra.gmra.mrb[18].mxu0 %v1728_v13  ;;  %4339 = vmatmul.mubr.f32.vlgmr.msra.gmra.mrb[12].mxu1 %v1728_v13  ;;  %v1939_v14 = vmul.f32 %v6509_v48, %v1728_v13 }
 0x653   : > { %4373 = vmatprep.mubr.msk.f32.mxu0 %vm5822_vm0, %v5823_v8  ;;  %4408 = vmatprep.mubr.msk.f32.mxu1 %vm5822_vm0, %v5823_v8 }
 0x654   : > { %1940 = vadd.xlane.f32.xlu0 %v1939_v14  ;;  %5072 = vmatpush3.bf16.msra.mxu0 %v6592_v11 }
 0x655   : > { %5073 = vmatprep.subr.bf16.mxu0 %v5821_v5  ;;  %5096 = vmatpush3.bf16.msra.mxu1 %v6625_v47 }
 0x656   : > { %5097 = vmatprep.subr.bf16.mxu1 %v5821_v5 }
 0x658   : > { %5075 = vmatpush3.bf16.msra.mxu0 %v6595_v22 }
 0x659   : > { %5076 = vmatprep.subr.bf16.mxu0 %v5821_v5  ;;  %5099 = vmatpush3.bf16.msra.mxu1 %v6628_v59 }
 0x65a   : > { %5100 = vmatprep.subr.bf16.mxu1 %v5821_v5 }
 0x65c   : > { %5078 = vmatpush3.bf16.msra.mxu0 %v6599_v9 }
 0x65d   : > { %5079 = vmatprep.subr.bf16.mxu0 %v5821_v5  ;;  %5102 = vmatpush3.bf16.msra.mxu1 %v6632_v53 }
 0x65e   : > { %5103 = vmatprep.subr.bf16.mxu1 %v5821_v5 }
 0x660   : > { %5081 = vmatpush3.bf16.msra.mxu0 %v6603_v36 }
 0x661   : > { %5082 = vmatprep.subr.bf16.mxu0 %v5821_v5  ;;  %5105 = vmatpush3.bf16.msra.mxu1 %v6636_v61 }
 0x662   : > { %5106 = vmatprep.subr.bf16.mxu1 %v5821_v5 }
 0x664   : > { %5084 = vmatpush3.bf16.msra.mxu0 %v6607_v41 }
 0x665   : > { %5085 = vmatprep.subr.bf16.mxu0 %v5821_v5  ;;  %5108 = vmatpush3.bf16.msra.mxu1 %v6640_v7 }
 0x666   : > { %5109 = vmatprep.subr.bf16.mxu1 %v5821_v5 }
 0x668   : > { %5087 = vmatpush3.bf16.msra.mxu0 %v6613_v62 }
 0x669   : > { %5088 = vmatprep.subr.bf16.mxu0 %v5821_v5  ;;  %5111 = vmatpush3.bf16.msra.mxu1 %v6644_v44 }
 0x66a   : > { %5112 = vmatprep.subr.bf16.mxu1 %v5821_v5 }
 0x66c   : > { %5090 = vmatpush3.bf16.msra.mxu0 %v6617_v21 }
 0x66d   : > { %5091 = vmatprep.subr.bf16.mxu0 %v5821_v5  ;;  %5114 = vmatpush3.bf16.msra.mxu1 %v6661_v17 }
 0x66e   : > { %5115 = vmatprep.subr.bf16.mxu1 %v5821_v5 }
 0x671   : > { %5117 = vmatpush3.bf16.msra.mxu1 %v6667_v32 }
 0x672   : > { %5142 = vmatprep.subr.bf16.mxu1 %v5821_v5 }
 0x68d   : > { %v1815_v43 = vpop.f32.mrb[10].mxu1 }
 0x68e   : > { %v1819_v45 = vadd.f32 %v6387_v34, %v1815_v43  ;;  %v4270_v46 = vpop.f32.mrb[11].mxu1  ;;  %v6621_v34 = vpack.c.bf16 %v2054_v29, %v2053_v24 }
 0x690   : > { %5093 = vmatpush3.bf16.msra.mxu0 %v6621_v34 }
 0x691   : > { %5118 = vmatprep.subr.bf16.mxu0 %v5821_v5 }
 0x6e1   : > { %v1941_v46 = vpop.xlane.xlu0 %1940 }
 0x725   : > { %v1902_v20 = vpop.f32.mrb[18].mxu0  ;;  %v2033_v50 = vpop.f32.mrb[12].mxu1 }
 0x726   : > { %v1906_v56 = vadd.f32 %v1902_v20, %v1819_v45  ;;  %v4305_v10 = vpop.f32.mrb[19].mxu0  ;;  %v4340_v13 = vpop.f32.mrb[13].mxu1 }
 0x728   : > { %5468 = vtanh.f32 %v1906_v56 }
 0x732   : > { %v5469_v14 = vpop.eup %5468 }
 0x733   : > { %3370 = vst [vmem:[%s6187_s15 + $0x18] sm:$0xff] %v5469_v14  ;;  %4374 = vmatmul.mubr.f32.vlgmr.msra.gmra.mrb[20].mxu0 %v5469_v14  ;;  %v1928_v23 = vmul.f32 %v5469_v14, %v6552_v51 }
 0x734   : > { %5120 = vmatpush3.bf16.msra.mxu0 %v6554_v54  ;;  %4443 = vmatprep.mubr.msk.f32.mxu0 %vm5822_vm0, %v5823_v8 }
 0x735   : > { %1929 = vadd.xlane.f32.xlu1 %v1928_v23  ;;  %5121 = vmatprep.subr.bf16.mxu0 %v5821_v5 }
 0x738   : > { %5123 = vmatpush3.bf16.msra.mxu0 %v6559_v35 }
 0x739   : > { %5124 = vmatprep.subr.bf16.mxu0 %v5821_v5  ;;  %2225 = vadd.xlane.f32.xlu1 %v2224_v25 }
 0x73c   : > { %5126 = vmatpush3.bf16.msra.mxu0 %v6565_v58 }
 0x73d   : > { %5127 = vmatprep.subr.bf16.mxu0 %v5821_v5 }
 0x740   : > { %5129 = vmatpush3.bf16.msra.mxu0 %v6569_v16 }
 0x741   : > { %5130 = vmatprep.subr.bf16.mxu0 %v5821_v5 }
 0x744   : > { %5132 = vmatpush3.bf16.msra.mxu0 %v6573_v4 }
 0x745   : > { %5133 = vmatprep.subr.bf16.mxu0 %v5821_v5 }
 0x748   : > { %5135 = vmatpush3.bf16.msra.mxu0 %v6485_v28 }
 0x749   : > { %5136 = vmatprep.subr.bf16.mxu0 %v5821_v5 }
 0x74c   : > { %5138 = vmatpush3.bf16.msra.mxu0 %v6496_v31 }
 0x74d   : > { %5139 = vmatprep.subr.bf16.mxu0 %v5821_v5 }
 0x750   : > { %5141 = vmatpush3.bf16.msra.mxu0 %v6500_v37 }
 0x751   : > { %5166 = vmatprep.subr.bf16.mxu0 %v5821_v5 }
 0x7c2   : > { %v1930_v43 = vpop.xlane.xlu1 %1929 }
 0x7c3   : > { %v1931_v45 = vadd.f32 %v1930_v43, %v1920_v40 }
 0x7c5   : > { %v1942_v52 = vadd.f32 %v1941_v46, %v1931_v45  ;;  %v2873_v45 = vld [vmem:[#allocation15 + $0x60] sm:$0xff]  ;;  %v2874_v46 = vld [vmem:[#allocation15 + $0x68] sm:$0xff] }
 0x7c6   : > { %v2226_v20 = vpop.xlane.xlu1 %2225 }
 0x7c7   : > { %v1966_v2 = vmul.f32 %v6682_v49, %v1942_v52 }
 0x7c9   : > { %v2034_v12 = vadd.f32 %v2033_v50, %v1966_v2  ;;  %v5281_v2 = vpack.c.bf16 %v2874_v46, %v2873_v45 }
 0x7cb   : > { %4409 = vmatmul.mubr.f32.vlgmr.msra.gmra.mrb[14].mxu1 %v2034_v12  ;;  %4444 = vmatmul.mubr.f32.vlgmr.msra.gmra.mrb[22].mxu0 %v2034_v12  ;;  %v2245_v24 = vmul.f32 %v6509_v48, %v2034_v12  ;;  %v2876_v12 = vld [vmem:[#allocation15 + $0x78] sm:$0xff] }
 0x7cc   : > { %5144 = vmatpush3.bf16.msra.mxu1 %v6592_v11  ;;  %4478 = vmatprep.mubr.msk.f32.mxu1 %vm5822_vm0, %v5823_v8 }
 0x7cd   : > { %2246 = vadd.xlane.f32.xlu1 %v2245_v24  ;;  %5145 = vmatprep.subr.bf16.mxu1 %v5821_v5 }
 0x7ce   : > { %5168 = vmatpush3.bf16.msra.mxu0 %v6625_v47  ;;  %4513 = vmatprep.mubr.msk.f32.mxu0 %vm5822_vm0, %v5823_v8 }
 0x7cf   : > { %5169 = vmatprep.subr.bf16.mxu0 %v5821_v5 }
 0x7d0   : > { %5147 = vmatpush3.bf16.msra.mxu1 %v6595_v22 }
 0x7d1   : > { %5148 = vmatprep.subr.bf16.mxu1 %v5821_v5 }
 0x7d2   : > { %5171 = vmatpush3.bf16.msra.mxu0 %v6628_v59 }
 0x7d3   : > { %5172 = vmatprep.subr.bf16.mxu0 %v5821_v5 }
 0x7d4   : > { %5150 = vmatpush3.bf16.msra.mxu1 %v6599_v9 }
 0x7d5   : > { %5151 = vmatprep.subr.bf16.mxu1 %v5821_v5 }
 0x7d6   : > { %5174 = vmatpush3.bf16.msra.mxu0 %v6632_v53 }
 0x7d7   : > { %5175 = vmatprep.subr.bf16.mxu0 %v5821_v5 }
 0x7d8   : > { %5153 = vmatpush3.bf16.msra.mxu1 %v6603_v36 }
 0x7d9   : > { %5154 = vmatprep.subr.bf16.mxu1 %v5821_v5 }
 0x7da   : > { %5177 = vmatpush3.bf16.msra.mxu0 %v6636_v61 }
 0x7db   : > { %5178 = vmatprep.subr.bf16.mxu0 %v5821_v5 }
 0x7dc   : > { %5156 = vmatpush3.bf16.msra.mxu1 %v6607_v41 }
 0x7dd   : > { %5157 = vmatprep.subr.bf16.mxu1 %v5821_v5 }
 0x7de   : > { %5180 = vmatpush3.bf16.msra.mxu0 %v6640_v7 }
 0x7df   : > { %5181 = vmatprep.subr.bf16.mxu0 %v5821_v5 }
 0x7e0   : > { %5159 = vmatpush3.bf16.msra.mxu1 %v6613_v62 }
 0x7e1   : > { %5160 = vmatprep.subr.bf16.mxu1 %v5821_v5 }
 0x7e2   : > { %5183 = vmatpush3.bf16.msra.mxu0 %v6644_v44 }
 0x7e3   : > { %5184 = vmatprep.subr.bf16.mxu0 %v5821_v5 }
 0x7e4   : > { %5162 = vmatpush3.bf16.msra.mxu1 %v6617_v21 }
 0x7e5   : > { %5163 = vmatprep.subr.bf16.mxu1 %v5821_v5 }
 0x7e6   : > { %5186 = vmatpush3.bf16.msra.mxu0 %v6661_v17 }
 0x7e7   : > { %5187 = vmatprep.subr.bf16.mxu0 %v5821_v5 }
 0x7e8   : > { %5165 = vmatpush3.bf16.msra.mxu1 %v6621_v34 }
 0x7e9   : > { %5190 = vmatprep.subr.bf16.mxu1 %v5821_v5 }
 0x7ea   : > { %5189 = vmatpush3.bf16.msra.mxu0 %v6667_v32 }
 0x7eb   : > { %5214 = vmatprep.subr.bf16.mxu0 %v5821_v5 }
 0x806   : > { %v2121_v29 = vpop.f32.mrb[20].mxu0 }
 0x807   : > { %v4375_v33 = vpop.f32.mrb[21].mxu0  ;;  %v2125_v42 = vadd.f32 %v3376_v39, %v2121_v29 }
 0x85a   : > { %v2247_v10 = vpop.xlane.xlu1 %2246 }
 0x89e   : > { %v2208_v55 = vpop.f32.mrb[14].mxu1  ;;  %v2339_v63 = vpop.f32.mrb[22].mxu0 }
 0x89f   : > { %v2212_v1 = vadd.f32 %v2208_v55, %v2125_v42  ;;  %v4410_v57 = vpop.f32.mrb[15].mxu1  ;;  %v4445_v60 = vpop.f32.mrb[23].mxu0 }
 0x8a1   : > { %5470 = vtanh.f32 %v2212_v1 }
 0x8ab   : > { %v5471_v0 = vpop.eup %5470 }
 0x8ac   : > { %3377 = vst [vmem:[%s6187_s15 + $0x20] sm:$0xff] %v5471_v0  ;;  %4479 = vmatmul.mubr.f32.vlgmr.msra.gmra.mrb[16].mxu1 %v5471_v0  ;;  %v2234_v3 = vmul.f32 %v5471_v0, %v6552_v51 }
 0x8ad   : > { %5192 = vmatpush3.bf16.msra.mxu1 %v6554_v54  ;;  %4548 = vmatprep.mubr.msk.f32.mxu1 %vm5822_vm0, %v5823_v8 }
 0x8ae   : > { %2235 = vadd.xlane.f32.xlu0 %v2234_v3  ;;  %5193 = vmatprep.subr.bf16.mxu1 %v5821_v5 }
 0x8b1   : > { %5195 = vmatpush3.bf16.msra.mxu1 %v6559_v35 }
 0x8b2   : > { %5196 = vmatprep.subr.bf16.mxu1 %v5821_v5  ;;  %2531 = vadd.xlane.f32.xlu0 %v2530_v19 }
 0x8b5   : > { %5198 = vmatpush3.bf16.msra.mxu1 %v6565_v58 }
 0x8b6   : > { %5199 = vmatprep.subr.bf16.mxu1 %v5821_v5 }
 0x8b9   : > { %5201 = vmatpush3.bf16.msra.mxu1 %v6569_v16 }
 0x8ba   : > { %5202 = vmatprep.subr.bf16.mxu1 %v5821_v5 }
 0x8bd   : > { %5204 = vmatpush3.bf16.msra.mxu1 %v6573_v4 }
 0x8be   : > { %5205 = vmatprep.subr.bf16.mxu1 %v5821_v5 }
 0x8c1   : > { %5207 = vmatpush3.bf16.msra.mxu1 %v6485_v28 }
 0x8c2   : > { %5208 = vmatprep.subr.bf16.mxu1 %v5821_v5 }
 0x8c5   : > { %5210 = vmatpush3.bf16.msra.mxu1 %v6496_v31 }
 0x8c6   : > { %5211 = vmatprep.subr.bf16.mxu1 %v5821_v5 }
 0x8c9   : > { %5213 = vmatpush3.bf16.msra.mxu1 %v6500_v37 }
 0x8ca   : > { %5238 = vmatprep.subr.bf16.mxu1 %v5821_v5 }
 0x93b   : > { %v2236_v50 = vpop.xlane.xlu0 %2235 }
 0x93c   : > { %v2237_v56 = vadd.f32 %v2236_v50, %v2226_v20 }
 0x93e   : > { %v2248_v13 = vadd.f32 %v2247_v10, %v2237_v56 }
 0x93f   : > { %v2532_v24 = vpop.xlane.xlu0 %2531 }
 0x940   : > { %v2272_v18 = vmul.f32 %v6682_v49, %v2248_v13 }
 0x942   : > { %v2340_v14 = vadd.f32 %v2339_v63, %v2272_v18  ;;  %v3395_v63 = vld [vmem:[%s6954_s5] ss:$0 sm:$0xff] }
 0x944   : > { %4514 = vmatmul.mubr.f32.vlgmr.msra.gmra.mrb[24].mxu0 %v2340_v14  ;;  %4549 = vmatmul.mubr.f32.vlgmr.msra.gmra.mrb[18].mxu1 %v2340_v14  ;;  %v2551_v28 = vmul.f32 %v6509_v48, %v2340_v14  ;;  %v3383_v48 = vld [vmem:[%s6187_s15 + $0x28] sm:$0xff] }
 0x945   : > { %5216 = vmatpush3.bf16.msra.mxu0 %v6592_v11  ;;  %4583 = vmatprep.mubr.msk.f32.mxu0 %vm5822_vm0, %v5823_v8 }
 0x946   : > { %2552 = vadd.xlane.f32.xlu0 %v2551_v28  ;;  %5217 = vmatprep.subr.bf16.mxu0 %v5821_v5 }
 0x947   : > { %5240 = vmatpush3.bf16.msra.mxu1 %v6625_v47  ;;  %4618 = vmatprep.mubr.msk.f32.mxu1 %vm5822_vm0, %v5823_v8 }
 0x948   : > { %5241 = vmatprep.subr.bf16.mxu1 %v5821_v5 }
 0x949   : > { %5219 = vmatpush3.bf16.msra.mxu0 %v6595_v22 }
 0x94a   : > { %5220 = vmatprep.subr.bf16.mxu0 %v5821_v5 }
 0x94b   : > { %5243 = vmatpush3.bf16.msra.mxu1 %v6628_v59 }
 0x94c   : > { %5244 = vmatprep.subr.bf16.mxu1 %v5821_v5 }
 0x94d   : > { %5222 = vmatpush3.bf16.msra.mxu0 %v6599_v9 }
 0x94e   : > { %5223 = vmatprep.subr.bf16.mxu0 %v5821_v5 }
 0x94f   : > { %5246 = vmatpush3.bf16.msra.mxu1 %v6632_v53 }
 0x950   : > { %5247 = vmatprep.subr.bf16.mxu1 %v5821_v5 }
 0x951   : > { %5225 = vmatpush3.bf16.msra.mxu0 %v6603_v36 }
 0x952   : > { %5226 = vmatprep.subr.bf16.mxu0 %v5821_v5 }
 0x953   : > { %5249 = vmatpush3.bf16.msra.mxu1 %v6636_v61 }
 0x954   : > { %5250 = vmatprep.subr.bf16.mxu1 %v5821_v5 }
 0x955   : > { %5228 = vmatpush3.bf16.msra.mxu0 %v6607_v41 }
 0x956   : > { %5229 = vmatprep.subr.bf16.mxu0 %v5821_v5 }
 0x957   : > { %5252 = vmatpush3.bf16.msra.mxu1 %v6640_v7 }
 0x958   : > { %5253 = vmatprep.subr.bf16.mxu1 %v5821_v5 }
 0x959   : > { %5231 = vmatpush3.bf16.msra.mxu0 %v6613_v62 }
 0x95a   : > { %5232 = vmatprep.subr.bf16.mxu0 %v5821_v5 }
 0x95b   : > { %5255 = vmatpush3.bf16.msra.mxu1 %v6644_v44 }
 0x95c   : > { %5256 = vmatprep.subr.bf16.mxu1 %v5821_v5 }
 0x95d   : > { %5234 = vmatpush3.bf16.msra.mxu0 %v6617_v21 }
 0x95e   : > { %5235 = vmatprep.subr.bf16.mxu0 %v5821_v5 }
 0x95f   : > { %5258 = vmatpush3.bf16.msra.mxu1 %v6661_v17 }
 0x960   : > { %5259 = vmatprep.subr.bf16.mxu1 %v5821_v5 }
 0x961   : > { %5237 = vmatpush3.bf16.msra.mxu0 %v6621_v34 }
 0x962   : > { %5262 = vmatprep.subr.bf16.mxu0 %v5821_v5 }
 0x963   : > { %5261 = vmatpush3.bf16.msra.mxu1 %v6667_v32 }
 0x964   : > { %5286 = vmatprep.subr.bf16.mxu1 %v5821_v5 }
 0x97f   : > { %v2427_v31 = vpop.f32.mrb[16].mxu1 }
 0x980   : > { %v4480_v37 = vpop.f32.mrb[17].mxu1  ;;  %v2431_v23 = vadd.f32 %v3383_v48, %v2427_v31 }
 0x9d3   : > { %v2553_v39 = vpop.xlane.xlu0 %2552 }
 0xa17   : > { %v2514_v26 = vpop.f32.mrb[24].mxu0  ;;  %v2645_v27 = vpop.f32.mrb[18].mxu1 }
 0xa18   : > { %v2518_v6 = vadd.f32 %v2514_v26, %v2431_v23  ;;  %v4515_v30 = vpop.f32.mrb[25].mxu0  ;;  %v4550_v38 = vpop.f32.mrb[19].mxu1 }
 0xa1a   : > { %5472 = vtanh.f32 %v2518_v6 }
 0xa24   : > { %v5473_v25 = vpop.eup %5472 }
 0xa25   : > { %3384 = vst [vmem:[%s6187_s15 + $0x28] sm:$0xff] %v5473_v25  ;;  %4584 = vmatmul.mubr.f32.vlgmr.msra.gmra.mrb[26].mxu0 %v5473_v25  ;;  %v2540_v40 = vmul.f32 %v5473_v25, %v6552_v51  ;;  %v2871_v51 = vld [vmem:[#allocation15 + $0x50] sm:$0xff] }
 0xa26   : > { %5264 = vmatpush3.bf16.msra.mxu0 %v6554_v54  ;;  %4653 = vmatprep.mubr.msk.f32.mxu0 %vm5822_vm0, %v5823_v8  ;;  %v2872_v54 = vld [vmem:[#allocation15 + $0x58] sm:$0xff] }
 0xa27   : > { %2541 = vadd.xlane.f32.xlu1 %v2540_v40  ;;  %5265 = vmatprep.subr.bf16.mxu0 %v5821_v5  ;;  %v5278_v43 = vpack.c.bf16 %v2872_v54, %v2871_v51 }
 0xa2a   : > { %5267 = vmatpush3.bf16.msra.mxu0 %v6559_v35  ;;  %v3392_v35 = vld [vmem:[%s6169_s30 + $0x38] sm:$0xff] }
 0xa2b   : > { %5268 = vmatprep.subr.bf16.mxu0 %v5821_v5 }
 0xa2e   : > { %5270 = vmatpush3.bf16.msra.mxu0 %v6565_v58  ;;  %v3393_v58 = vld [vmem:[%s7003_s3] ss:$0 sm:$0xff] }
 0xa2f   : > { %5271 = vmatprep.subr.bf16.mxu0 %v5821_v5  ;;  %v2836_v52 = vmul.f32 %v3393_v58, %v3392_v35 }
 0xa31   : > { %2837 = vadd.xlane.f32.xlu1 %v2836_v52 }
 0xa32   : > { %5273 = vmatpush3.bf16.msra.mxu0 %v6569_v16  ;;  %v2875_v16 = vld [vmem:[#allocation15 + $0x70] sm:$0xff] }
 0xa33   : > { %5274 = vmatprep.subr.bf16.mxu0 %v5821_v5 }
 0xa36   : > { %5276 = vmatpush3.bf16.msra.mxu0 %v6573_v4  ;;  %v5284_v4 = vpack.c.bf16 %v2876_v12, %v2875_v16 }
 0xa37   : > { %5277 = vmatprep.subr.bf16.mxu0 %v5821_v5 }
 0xa3a   : > { %5279 = vmatpush3.bf16.msra.mxu0 %v5278_v43 }
 0xa3b   : > { %5280 = vmatprep.subr.bf16.mxu0 %v5821_v5 }
 0xa3e   : > { %5282 = vmatpush3.bf16.msra.mxu0 %v5281_v2 }
 0xa3f   : > { %5283 = vmatprep.subr.bf16.mxu0 %v5821_v5 }
 0xa42   : > { %5285 = vmatpush3.bf16.msra.mxu0 %v5284_v4 }
 0xa43   : > { %5310 = vmatprep.subr.bf16.mxu0 %v5821_v5 }
 0xab4   : > { %v2542_v29 = vpop.xlane.xlu1 %2541 }
 0xab5   : > { %v2543_v33 = vadd.f32 %v2542_v29, %v2532_v24 }
 0xab7   : > { %v2554_v42 = vadd.f32 %v2553_v39, %v2543_v33 }
 0xab9   : > { %v2578_v55 = vmul.f32 %v6682_v49, %v2554_v42 }
 0xabb   : > { %v2646_v1 = vadd.f32 %v2645_v27, %v2578_v55 }
 0xabd   : > { %4619 = vmatmul.mubr.f32.vlgmr.msra.gmra.mrb[20].mxu1 %v2646_v1  ;;  %4654 = vmatmul.mubr.f32.vlgmr.msra.gmra.mrb[28].mxu0 %v2646_v1  ;;  %v2857_v57 = vmul.f32 %v3395_v63, %v2646_v1 }
 0xabe   : > { %5288 = vmatpush3.bf16.msra.mxu1 %v6592_v11  ;;  %4688 = vmatprep.mubr.msk.f32.mxu1 %vm5822_vm0, %v5823_v8 }
 0xabf   : > { %2858 = vadd.xlane.f32.xlu1 %v2857_v57  ;;  %5289 = vmatprep.subr.bf16.mxu1 %v5821_v5 }
 0xac0   : > { %5312 = vmatpush3.bf16.msra.mxu0 %v6625_v47  ;;  %4723 = vmatprep.mubr.msk.f32.mxu0 %vm5822_vm0, %v5823_v8 }
 0xac1   : > { %5313 = vmatprep.subr.bf16.mxu0 %v5821_v5 }
 0xac2   : > { %5291 = vmatpush3.bf16.msra.mxu1 %v6595_v22  ;;  %v3390_v22 = vld [vmem:[%s6187_s15 + $0x30] sm:$0xff] }
 0xac3   : > { %5292 = vmatprep.subr.bf16.mxu1 %v5821_v5 }
 0xac4   : > { %5315 = vmatpush3.bf16.msra.mxu0 %v6628_v59  ;;  %v3394_v59 = vld [vmem:[%s6953_s4] ss:$0 sm:$0xff] }
 0xac5   : > { %5316 = vmatprep.subr.bf16.mxu0 %v5821_v5 }
 0xac6   : > { %5294 = vmatpush3.bf16.msra.mxu1 %v6599_v9 }
 0xac7   : > { %5295 = vmatprep.subr.bf16.mxu1 %v5821_v5 }
 0xac8   : > { %5318 = vmatpush3.bf16.msra.mxu0 %v6632_v53 }
 0xac9   : > { %5319 = vmatprep.subr.bf16.mxu0 %v5821_v5 }
 0xaca   : > { %5297 = vmatpush3.bf16.msra.mxu1 %v6603_v36 }
 0xacb   : > { %5298 = vmatprep.subr.bf16.mxu1 %v5821_v5 }
 0xacc   : > { %5321 = vmatpush3.bf16.msra.mxu0 %v6636_v61 }
 0xacd   : > { %5322 = vmatprep.subr.bf16.mxu0 %v5821_v5 }
 0xace   : > { %5300 = vmatpush3.bf16.msra.mxu1 %v6607_v41 }
 0xacf   : > { %5301 = vmatprep.subr.bf16.mxu1 %v5821_v5 }
 0xad0   : > { %5324 = vmatpush3.bf16.msra.mxu0 %v6640_v7 }
 0xad1   : > { %5325 = vmatprep.subr.bf16.mxu0 %v5821_v5 }
 0xad2   : > { %5303 = vmatpush3.bf16.msra.mxu1 %v6613_v62 }
 0xad3   : > { %5304 = vmatprep.subr.bf16.mxu1 %v5821_v5 }
 0xad4   : > { %5327 = vmatpush3.bf16.msra.mxu0 %v6644_v44 }
 0xad5   : > { %5328 = vmatprep.subr.bf16.mxu0 %v5821_v5 }
 0xad6   : > { %5306 = vmatpush3.bf16.msra.mxu1 %v6617_v21 }
 0xad7   : > { %5307 = vmatprep.subr.bf16.mxu1 %v5821_v5 }
 0xad8   : > { %5330 = vmatpush3.bf16.msra.mxu0 %v6661_v17 }
 0xad9   : > { %5331 = vmatprep.subr.bf16.mxu0 %v5821_v5 }
 0xada   : > { %5309 = vmatpush3.bf16.msra.mxu1 %v6621_v34  ;;  %v2838_v34 = vpop.xlane.xlu1 %2837 }
 0xadc   : > { %5333 = vmatpush3.bf16.msra.mxu0 %v6667_v32 }
 0xaf8   : > { %v2733_v8 = vpop.f32.mrb[26].mxu0 }
 0xaf9   : > { %v4585_v11 = vpop.f32.mrb[27].mxu0  ;;  %v2737_v9 = vadd.f32 %v3390_v22, %v2733_v8 }
 0xb4c   : > { %v2859_v44 = vpop.xlane.xlu1 %2858 }
 0xb90   : > { %v2820_v36 = vpop.f32.mrb[20].mxu1  ;;  %v2951_v41 = vpop.f32.mrb[28].mxu0 }
 0xb91   : > { %v2824_v62 = vadd.f32 %v2820_v36, %v2737_v9  ;;  %v4620_v47 = vpop.f32.mrb[21].mxu1  ;;  %v4655_v21 = vpop.f32.mrb[29].mxu0 }
 0xb93   : > { %5474 = vtanh.f32 %v2824_v62 }
 0xb9d   : > { %v5475_v53 = vpop.eup %5474 }
 0xb9e   : > { %3391 = vst [vmem:[%s6187_s15 + $0x30] sm:$0xff] %v5475_v53  ;;  %4689 = vmatmul.mubr.f32.vlgmr.msra.gmra.mrb[22].mxu1 %v5475_v53  ;;  %v2846_v5 = vmul.f32 %v5475_v53, %v3394_v59 }
 0xba0   : > { %2847 = vadd.xlane.f32.xlu0 %v2846_v5 }
 0xc2d   : > { %v2848_v61 = vpop.xlane.xlu0 %2847 }
 0xc2e   : > { %v2849_v7 = vadd.f32 %v2848_v61, %v2838_v34 }
 0xc30   : > { %v2860_v17 = vadd.f32 %v2859_v44, %v2849_v7 }
 0xc32   : > { %v2884_v32 = vmul.f32 %v6682_v49, %v2860_v17 }
 0xc34   : > { %v2952_v60 = vadd.f32 %v2951_v41, %v2884_v32 }
 0xc36   : > { %3134 = vst [vmem:[#allocation3] sm:$0xff] %v2952_v60  ;;  %3136 = vst [vmem:[#allocation19] sm:$0xff] %v2952_v60  ;;  %4724 = vmatmul.mubr.f32.vlgmr.msra.gmra.mrb[30].mxu0 %v2952_v60 }
 0xc71   : > { %v3039_v0 = vpop.f32.mrb[22].mxu1 }
 0xc72   : > { %v4690_v3 = vpop.f32.mrb[23].mxu1  ;;  %v3043_v19 = vadd.f32 %v3397_v15, %v3039_v0 }
 0xd09   : > { %v3126_v20 = vpop.f32.mrb[30].mxu0 }
 0xd0a   : > { %v3130_v50 = vadd.f32 %v3126_v20, %v3043_v19  ;;  %v4725_v56 = vpop.f32.mrb[31].mxu0 }
 0xd0c   : > { %5476 = vtanh.f32 %v3130_v50 }
 0xd16   : > { %v5477_v49 = vpop.eup %5476 }
 0xd17   : > { %3398 = vst [vmem:[%s6187_s15 + $0x38] sm:$0xff] %v5477_v49  ;;  %3133 = vst [vmem:[#allocation2] sm:$0xff] %v5477_v49 }
 0xd18   : > { %3135 = vst [vmem:[#allocation17] sm:$0xff] %v5477_v49 }
 0xd19   : > { %5689 = shalt.err (!%p5686_p13)
}
 0xd1a   : > { %s7007_s6 = sld [smem:[#allocation33_spill]]  ;;  %p7008_p2 = pmov %p7006_p6 }
 0xd20   : > { %s5690_s1 = scalar_lea.hbm %s7007_s6, 128 }
 0xd21   : > { %p5691_p0 = scmp.ne.s32.totalorder %s7007_s6, %s5690_s1  ;;  %p5696_p11 = scmp.lt.u32.totalorder %s5690_s1, %s7007_s6 }
 0xd23   : > { %p5692_p9 = pnand %p5691_p0, %p7008_p2 }
 0xd25   : > { %p5693_p10 = pneg %p5692_p9 }
 0xd27   : > { %p5698_p7 = pnand %p5696_p11, %p5693_p10 }
 0xd29   : > { %5701 = shalt.err (!%p5698_p7)
}
 0xd2a   : > { %p7009_p12 = pmov %p7008_p2  ;;  %s3138_s11 = scalar_lea.sflag [#allocation6], %s6165_s24 }
 0xd2b   : > { %s5702_s13 = scalar_lea.vmem %s6857_s20, 1024  ;;  %p7010_p8 = scmp.ne.s32.totalorder %s6990_s19, 0 }
 0xd2c   : > { %5362 = dma.vmem_to_hbm [thread:$0]  (%p7009_p12), %s3166_s22, 128, %s7007_s6, [#allocation18]  }
 0xd2d   : > { %p5703_p6 = scmp.ne.s32.totalorder %s6857_s20, %s5702_s13  ;;  %s5826_s0 = smov [#allocation16]  }
 0xd2e   : > { %s5706_s2 = sshll.u32 %s5826_s0, 4  ;;  %s5707_s2 = int_to_ptr.vmem [resolvable:$false] %s5706_s2 }
 0xd2f   : > { %p5704_p3 = pnand %p5703_p6, %p7010_p8  ;;  %s5708_s1 = scalar_lea.vmem %s5707_s2, 2048 }
 0xd30   : > { %p5709_p4 = scmp.lt.s32.totalorder %s6857_s20, %s5707_s2  ;;  %p5710_p5 = scmp.lt.s32.totalorder %s5708_s1, %s5702_s13 }
 0xd31   : > { %p5705_p1 = pneg %p5704_p3 }
 0xd32   : > { %p5711_p13 = por %p5710_p5, %p5709_p4 }
 0xd34   : > { %p5712_p0 = pnand %p5711_p13, %p5705_p1 }
 0xd36   : > { %5715 = shalt.err (!%p5712_p0)
}
 0xd37   : > { %s5716_s3 = scalar_lea.hbm %s6855_s23, 1024  ;;  %s5720_s30 = scalar_lea.hbm %s7005_s18, 2048 }
 0xd38   : > { %p5717_p2 = scmp.ne.s32.totalorder %s6855_s23, %s5716_s3  ;;  %p5721_p11 = scmp.lt.u32.totalorder %s6855_s23, %s7005_s18 }
 0xd39   : > { %p5722_p7 = scmp.lt.u32.totalorder %s5720_s30, %s5716_s3  ;;  %p5724_p6 = scmp.lt.u32.totalorder %s5716_s3, %s6855_s23 }
 0xd3a   : > { %p5718_p9 = pnand %p5717_p2, %p7010_p8 }
 0xd3b   : > { %p5723_p12 = por %p5722_p7, %p5721_p11 }
 0xd3c   : > { %p5719_p10 = pneg %p5718_p9 }
 0xd3d   : > { %p5725_p3 = por %p5724_p6, %p5723_p12 }
 0xd3f   : > { %p5726_p1 = pnand %p5725_p3, %p5719_p10 }
 0xd41   : > { %5729 = shalt.err (!%p5726_p1)
}
 0xd42   : > { %s5827_s13 = smov 128   ;;  %s5828_s2 = smov 8  }
 0xd43   : > { %5360 = dma.vmem_to_hbm [thread:$0]  (%p7010_p8), %s6857_s20, 1024, %s6855_s23, %s3138_s11, %s5827_s13, %s5827_s13, %s5828_s2  }
 0xd44   : > { %s5730_s1 = scalar_lea.vmem %s6860_s17, 128  ;;  %p7011_p5 = scmp.eq.s32.totalorder %s5920_s14, 1 }
 0xd45   : > { %p5731_p4 = scmp.ne.s32.totalorder %s6860_s17, %s5730_s1  ;;  %p5737_p2 = scmp.lt.s32.totalorder %s6860_s17, %s6860_s17 }
 0xd46   : > { %p5738_p9 = scmp.lt.s32.totalorder %s5730_s1, %s5730_s1 }
 0xd47   : > { %p5732_p13 = pnand %p5731_p4, %p7011_p5 }
 0xd48   : > { %p5739_p10 = por %p5738_p9, %p5737_p2 }
 0xd49   : > { %p5733_p0 = pneg %p5732_p13 }
 0xd4b   : > { %p5740_p11 = pnand %p5739_p10, %p5733_p0 }
 0xd4d   : > { %5743 = shalt.err (!%p5740_p11)
}
 0xd4e   : > { %s7012_s15 = sld [smem:[#allocation34_spill]]  ;;  %p7013_p7 = pmov %p7011_p5 }
 0xd54   : > { %s5744_s30 = scalar_lea.hbm %s7012_s15, 128 }
 0xd55   : > { %p5745_p8 = scmp.ne.s32.totalorder %s7012_s15, %s5744_s30  ;;  %p5750_p3 = scmp.lt.u32.totalorder %s5744_s30, %s7012_s15 }
 0xd57   : > { %p5746_p12 = pnand %p5745_p8, %p7013_p7 }
 0xd59   : > { %p5747_p6 = pneg %p5746_p12 }
 0xd5b   : > { %p5752_p1 = pnand %p5750_p3, %p5747_p6 }
 0xd5d   : > { %5755 = shalt.err (!%p5752_p1)
}
 0xd5e   : > { %p7014_p4 = pmov %p7011_p5 }
 0xd60   : > { %5364 = dma.vmem_to_hbm [thread:$0]  (%p7014_p4), %s6860_s17, 128, %s7012_s15, [#allocation18]  }
 0xd61   : > { %p7015_p5 = pmov %p7014_p4 }
 0xd62   : > { %p7016_p13 = pmov %p7014_p4 }
 0xd63   : > { %5789 = dma.done.wait (%p7015_p5), [#allocation18], 256  }
 0xd64   : > { %5791 = vsyncadd (%p7016_p13), [#allocation18], 4294967040 }
 0xd65 PF: > { %s3196_s0 = sand.u32 1, %s5798_s25   ;;  %p7017_p0 = scmp.ne.s32.totalorder %s6991_s21, 0 }
 0xd66   : > { %p7018_p2 = scmp.ge.s32.totalorder %s5810_s28, 2  ;;  %s3197_s13 = scalar_lea.sflag [#allocation6], %s3196_s0 }
 0xd68   : > { %p5394_p9 = pnand %p7018_p2, %p7017_p0 }
 0xd6a   : > { %5793 = dma.done.wait (!%p5394_p9), %s3197_s13, 1024  }
 0xd6b   : > { %5795 = vsyncadd (!%p5394_p9), %s3197_s13, 4294966272  ;;  %p31_p10 = scmp.ge.s32.totalorder %s6081_s16, 4   ;;  %s7019_s25 = smov %s5802_s26 }
 0xd6c   : > { %s7020_s26 = smov %s5806_s27  ;;  %s7021_s27 = smov %s6092_s10 }
 0xd6d   : > { %s7022_s28 = smov %s6081_s16  ;;  %33 = sbr.rel (!%p31_p10) target bundleno = 19 (0x13), region = 167 }
 0xd74   :  { %3202 = vsyncpa [#allocation5], 1 }
 0xd75   :  { %3204 = vsyncpa [#allocation5 + $0x1], 1 }
 0xd76   :  { %3205 = vsyncpa [#allocation8], 1 }
 0xd77   :  { %3206 = vsyncpa [#allocation11], 1 }
 0xd78   :  { %3207 = vsyncpa [#allocation14], 1 }
 0xd79   :  { %3208 = vsyncpa [#allocation6], 1 }
 0xd7a   :  { %3210 = vsyncpa [#allocation6 + $0x1], 1 }
 0xd7b   :  { %3211 = vsyncpa [#allocation18], 1 }

</bundles_post_ra>
